<compile_context>
chip_gen: v7x
topology: tpu7x:2x2x1
jax: 0.10.0
libtpu: 0.0.40
codegen_flags: <defaults>
</compile_context>

<pallas_src>
import functools

import jax
import jax.numpy as jnp
from jax.experimental import pallas as pl
from jax.experimental.pallas import tpu as pltpu


def _round_up(x, m):
    return (x + m - 1) // m * m


def rnn_seq_kernel(x_ref, h0_ref, w_ref, b_ref, out_ref, h_ref,
                   *, tc, t_total, h_pad, has_tail):
    """One grid step == Tc RNN timesteps.  h_ref is the VMEM-resident hidden."""
    g = pl.program_id(0)

    @pl.when(g == 0)
    def _():
        h_ref[...] = h0_ref[...]

    b_pad = h_ref.shape[0]
    ho_pad = b_ref.shape[1]
    # Hoisted out of the time loop: one sublane-broadcast of the fused bias.
    # Padded class lanes already carry -1e30, so no per-step masking is needed.
    bias = jnp.broadcast_to(b_ref[...], (b_pad, ho_pad))

    def step(t, hid):
        inp = x_ref[t]                                    # (B_pad, I_pad)
        # Lane-aligned concat (I_pad, H_pad are multiples of 128) -> one K=256 matmul.
        combined = jnp.concatenate([inp, hid], axis=1)    # (B_pad, I_pad + H_pad)
        fused = jnp.dot(combined, w_ref[...],
                        preferred_element_type=jnp.float32) + bias
        new_hidden = fused[:, :h_pad]                     # (B_pad, H_pad)
        logits = fused[:, h_pad:]                         # (B_pad, O_pad); pads ~= -1e30

        # Numerically stable log-softmax over the class dim.
        m = jnp.max(logits, axis=1, keepdims=True)
        shifted = logits - m
        lse = jnp.log(jnp.sum(jnp.exp(shifted), axis=1, keepdims=True))
        out_ref[t] = (shifted - lse).astype(out_ref.dtype)

        if has_tail:
            # Only emitted when T % Tc != 0: freeze the hidden on padded steps.
            valid = (g * tc + t) < t_total
            new_hidden = jnp.where(valid, new_hidden, hid)
        return new_hidden

    h_ref[...] = jax.lax.fori_loop(0, tc, step, h_ref[...], unroll=True)


def prepare_params(params, input_size, hidden_size, output_size):
    """Fuse + pad the two Linear layers ONCE (hoisted out of the per-call path).

    Returns:
      w: (I_pad + H_pad, H_pad + O_pad) fused weight, zero-padded.
      b: (1, H_pad + O_pad) fused bias; padded class lanes set to -1e30 so the
         log-softmax ignores them with zero in-kernel masking work.
    """
    I, H, O = input_size, hidden_size, output_size
    I_pad, H_pad, O_pad = _round_up(I, 128), _round_up(H, 128), _round_up(O, 128)
    HO_pad = H_pad + O_pad
    wh_t, bh, wo_t, bo = params["wh_t"], params["bh"], params["wo_t"], params["bo"]

    w = jnp.zeros((I_pad + H_pad, HO_pad), jnp.float32)
    w = w.at[:I, :H].set(wh_t[:I])
    w = w.at[:I, H_pad:H_pad + O].set(wo_t[:I])
    w = w.at[I_pad:I_pad + H, :H].set(wh_t[I:])
    w = w.at[I_pad:I_pad + H, H_pad:H_pad + O].set(wo_t[I:])

    b = jnp.zeros((1, HO_pad), jnp.float32)
    b = b.at[0, :H].set(bh)
    b = b.at[0, H_pad:H_pad + O].set(bo)
    b = b.at[0, H_pad + O:].set(-1e30)   # mask padded class lanes via the bias

    return {"w": w, "b": b}


def rnn_forward(seq, hidden0, w, b, *, out_size, time_block=32):
    """Run the RNN over a sequence inside one kernel.

    seq:     (T, B, I)  per-step inputs
    hidden0: (B, H)     initial hidden state
    w, b:    fused/padded params from prepare_params
    returns: (log_probs (T, B, O), final_hidden (B, H))
    """
    T, B, I = seq.shape
    H = hidden0.shape[1]
    O = out_size

    B_pad = _round_up(B, 8)
    I_pad = _round_up(I, 128)
    H_pad = _round_up(H, 128)
    HO_pad = b.shape[1]
    O_pad = HO_pad - H_pad

    Tc = min(T, time_block)
    n_blocks = pl.cdiv(T, Tc)
    T_pad = n_blocks * Tc
    has_tail = (T_pad != T)

    x_pad = jnp.zeros((T_pad, B_pad, I_pad), jnp.float32).at[:T, :B, :I].set(seq)
    h0_pad = jnp.zeros((B_pad, H_pad), jnp.float32).at[:B, :H].set(hidden0)

    kernel = functools.partial(rnn_seq_kernel, tc=Tc, t_total=T,
                               h_pad=H_pad, has_tail=has_tail)

    out_pad, hN_pad = pl.pallas_call(
        kernel,
        out_shape=(
            jax.ShapeDtypeStruct((T_pad, B_pad, O_pad), jnp.float32),  # per-step log-probs
            jax.ShapeDtypeStruct((B_pad, H_pad), jnp.float32),          # final hidden
        ),
        grid=(n_blocks,),
        in_specs=[
            pl.BlockSpec((Tc, B_pad, I_pad), lambda g: (g, 0, 0)),       # streamed Tc steps
            pl.BlockSpec((B_pad, H_pad), lambda g: (0, 0)),              # h0 (loaded once)
            pl.BlockSpec((I_pad + H_pad, HO_pad), lambda g: (0, 0)),     # fused W (once)
            pl.BlockSpec((1, HO_pad), lambda g: (0, 0)),                 # fused bias (once)
        ],
        out_specs=(
            pl.BlockSpec((Tc, B_pad, O_pad), lambda g: (g, 0, 0)),       # lane-dense output
            pl.BlockSpec((B_pad, H_pad), lambda g: (0, 0)),              # VMEM-resident hidden
        ),
        compiler_params=pltpu.CompilerParams(
            dimension_semantics=("arbitrary",)),   # recurrence along blocked T
    )(x_pad, h0_pad, w, b)

    return out_pad[:T, :B, :O], hN_pad[:B, :H]


def rnn_cell(inp, hidden, w, b, *, out_size):
    """Exactly the PyTorch forward(): one step, returns (log_probs, new_hidden)."""
    out, new_h = rnn_forward(inp[None], hidden, w, b, out_size=out_size)
    return out[0], new_h


def init_params(key, input_size, hidden_size, output_size):
    """Deterministic init mimicking nn.Linear (uniform +-1/sqrt(fan_in)).

    Weights stored pre-transposed: (in_features, out_features)."""
    k1, k2, k3, k4 = jax.random.split(key, 4)
    fan_in = input_size + hidden_size
    bound = 1.0 / jnp.sqrt(float(fan_in))
    wh_t = jax.random.uniform(k1, (fan_in, hidden_size), jnp.float32, -bound, bound)
    bh = jax.random.uniform(k2, (hidden_size,), jnp.float32, -bound, bound)
    wo_t = jax.random.uniform(k3, (fan_in, output_size), jnp.float32, -bound, bound)
    bo = jax.random.uniform(k4, (output_size,), jnp.float32, -bound, bound)
    return {"wh_t": wh_t, "bh": bh, "wo_t": wo_t, "bo": bo}


if __name__ == "__main__":
    INPUT, HIDDEN, OUTPUT = 16, 32, 8
    B = 2

    key = jax.random.PRNGKey(0)
    k_seq, k_hid, k_par, k_seq2 = jax.random.split(key, 4)

    params = init_params(k_par, INPUT, HIDDEN, OUTPUT)
    packed = prepare_params(params, INPUT, HIDDEN, OUTPUT)   # done once, not per call

    fwd = jax.jit(functools.partial(rnn_forward, out_size=OUTPUT))

    def reference(seq, h0):
        h = h0
        outs = []
        for t in range(seq.shape[0]):
            combined = jnp.concatenate([seq[t], h], axis=1)
            h_new = combined @ params["wh_t"] + params["bh"]
            logits = combined @ params["wo_t"] + params["bo"]
            outs.append(jax.nn.log_softmax(logits, axis=1))
            h = h_new
        return jnp.stack(outs), h

    # --- Test 1: short sequence (single grid step, whole sequence in VMEM) ---
    T1 = 8
    seq1 = jax.random.normal(k_seq, (T1, B, INPUT), jnp.float32)
    hidden0 = jax.random.normal(k_hid, (B, HIDDEN), jnp.float32)
    lp1, hN1 = fwd(seq1, hidden0, packed["w"], packed["b"])
    jax.block_until_ready((lp1, hN1))
    ref_lp1, ref_h1 = reference(seq1, hidden0)
    assert lp1.shape == (T1, B, OUTPUT) and hN1.shape == (B, HIDDEN)
    assert jnp.allclose(lp1, ref_lp1, atol=2e-4), "short-seq log-softmax mismatch"
    assert jnp.allclose(hN1, ref_h1, atol=2e-4), "short-seq final hidden mismatch"

    # --- Test 2: longer sequence (multiple time blocks + ragged tail) ---
    T2 = 40
    seq2 = jax.random.normal(k_seq2, (T2, B, INPUT), jnp.float32)
    lp2, hN2 = fwd(seq2, hidden0, packed["w"], packed["b"])
    jax.block_until_ready((lp2, hN2))
    ref_lp2, ref_h2 = reference(seq2, hidden0)
    assert jnp.allclose(lp2, ref_lp2, atol=2e-4), "long-seq log-softmax mismatch"
    assert jnp.allclose(hN2, ref_h2, atol=2e-4), "long-seq final hidden mismatch"

    # --- Single step: exactly the PyTorch module forward signature ---
    out1, h1 = rnn_cell(seq1[0], hidden0, packed["w"], packed["b"], out_size=OUTPUT)
    comb0 = jnp.concatenate([seq1[0], hidden0], axis=1)
    ref_h1s = comb0 @ params["wh_t"] + params["bh"]
    ref_o1s = jax.nn.log_softmax(comb0 @ params["wo_t"] + params["bo"], axis=1)
    assert jnp.allclose(h1, ref_h1s, atol=2e-4), "single-step hidden mismatch"
    assert jnp.allclose(out1, ref_o1s, atol=2e-4), "single-step output mismatch"

    print("KERNEL_OK")
</pallas_src>

<mosaic_0001>
module attributes {stable_mosaic.version = 11 : i64} {
  func.func @rnn_seq_kernel(%arg0: i32, %arg1: memref<8x8x128xf32, #tpu.memory_space<vmem>>, %arg2: memref<8x128xf32, #tpu.memory_space<vmem>>, %arg3: memref<256x256xf32, #tpu.memory_space<vmem>>, %arg4: memref<1x256xf32, #tpu.memory_space<vmem>>, %arg5: memref<8x8x128xf32, #tpu.memory_space<vmem>>, %arg6: memref<8x128xf32, #tpu.memory_space<vmem>>) attributes {dimension_semantics = [#tpu.dimension_semantics<arbitrary>], iteration_bounds = array<i64: 1>, scalar_prefetch = 0 : i64, scratch_operands = 0 : i64, tpu.core_type = #tpu.core_type<tc>, window_params = [{transform_indices = @transform_0, window_bounds = array<i64: 8, 8, 128>}, {pipeline_mode = #tpu.pipeline_mode<synchronous>, transform_indices = @transform_1, window_bounds = array<i64: 8, 128>}, {pipeline_mode = #tpu.pipeline_mode<synchronous>, transform_indices = @transform_2, window_bounds = array<i64: 256, 256>}, {pipeline_mode = #tpu.pipeline_mode<synchronous>, transform_indices = @transform_3, window_bounds = array<i64: 1, 256>}, {transform_indices = @transform_4, window_bounds = array<i64: 8, 8, 128>}, {pipeline_mode = #tpu.pipeline_mode<synchronous>, transform_indices = @transform_5, window_bounds = array<i64: 8, 128>}]} {
    %c0_i32 = arith.constant 0 : i32
    %0 = arith.cmpi eq, %arg0, %c0_i32 : i32
    %1 = arith.extui %0 : i1 to i32
    %c0_i32_0 = arith.constant 0 : i32
    %2 = arith.cmpi ne, %1, %c0_i32_0 : i32
    scf.if %2 {
      %c0_78 = arith.constant 0 : index
      %c0_79 = arith.constant 0 : index
      %192 = vector.load %arg2[%c0_78, %c0_79] : memref<8x128xf32, #tpu.memory_space<vmem>>, vector<8x128xf32>
      %c0_80 = arith.constant 0 : index
      %c0_81 = arith.constant 0 : index
      %193 = vector.load %arg6[%c0_80, %c0_81] : memref<8x128xf32, #tpu.memory_space<vmem>>, vector<8x128xf32>
      tpu.vector_store %arg6[%c0_80, %c0_81], %192 {strides = array<i32>} : memref<8x128xf32, #tpu.memory_space<vmem>>, vector<8x128xf32>,
    } else {
    }
    %c0 = arith.constant 0 : index
    %c0_1 = arith.constant 0 : index
    %3 = vector.load %arg4[%c0, %c0_1] : memref<1x256xf32, #tpu.memory_space<vmem>>, vector<1x256xf32>
    %4 = vector.shape_cast %3 : vector<1x256xf32> to vector<1x256xf32>
    %5 = vector.broadcast %4 : vector<1x256xf32> to vector<8x256xf32>
    %c0_2 = arith.constant 0 : index
    %c0_3 = arith.constant 0 : index
    %6 = vector.load %arg6[%c0_2, %c0_3] : memref<8x128xf32, #tpu.memory_space<vmem>>, vector<8x128xf32>
    %c0_i32_4 = arith.constant 0 : i32
    %7 = arith.index_cast %c0_i32_4 : i32 to index
    %c0_5 = arith.constant 0 : index
    %c0_6 = arith.constant 0 : index
    %8 = vector.load %arg1[%7, %c0_5, %c0_6] : memref<8x8x128xf32, #tpu.memory_space<vmem>>, vector<1x8x128xf32>
    %9 = vector.shape_cast %8 : vector<1x8x128xf32> to vector<8x128xf32>
    %10 = tpu.concatenate %9, %6 in 1 : vector<8x128xf32>, vector<8x128xf32> -> vector<8x256xf32>
    %c0_7 = arith.constant 0 : index
    %c0_8 = arith.constant 0 : index
    %11 = vector.load %arg3[%c0_7, %c0_8] : memref<256x256xf32, #tpu.memory_space<vmem>>, vector<256x256xf32>
    %cst = arith.constant dense<0.000000e+00> : vector<8x256xf32>
    %12 = tpu.matmul %10, %11, %cst {dimension_numbers = #tpu.dot_dimension_numbers<[1], [0], [0], [1], [0, 0, 1, 1], [], []>} : vector<8x256xf32>, vector<256x256xf32>, vector<8x256xf32> -> vector<8x256xf32>
    %13 = arith.addf %12, %5 : vector<8x256xf32>
    %14 = vector.extract_strided_slice %13 {offsets = [0, 0], sizes = [8, 128], strides = [1, 1]} : vector<8x256xf32> to vector<8x128xf32>
    %15 = vector.extract_strided_slice %13 {offsets = [0, 128], sizes = [8, 128], strides = [1, 1]} : vector<8x256xf32> to vector<8x128xf32>
    %cst_9 = arith.constant dense<0xFF800000> : vector<8xf32>
    %16 = vector.multi_reduction <maximumf>, %15, %cst_9 [1] : vector<8x128xf32> to vector<8xf32>
    %17 = vector.shape_cast %16 : vector<8xf32> to vector<8x1xf32>
    %18 = vector.broadcast %17 : vector<8x1xf32> to vector<8x128xf32>
    %19 = arith.subf %15, %18 : vector<8x128xf32>
    %20 = math.exp %19 : vector<8x128xf32>
    %cst_10 = arith.constant dense<0.000000e+00> : vector<8xf32>
    %21 = vector.multi_reduction <add>, %20, %cst_10 [1] : vector<8x128xf32> to vector<8xf32>
    %22 = vector.shape_cast %21 : vector<8xf32> to vector<8x1xf32>
    %23 = math.log %22 : vector<8x1xf32>
    %24 = vector.broadcast %23 : vector<8x1xf32> to vector<8x128xf32>
    %25 = arith.subf %19, %24 : vector<8x128xf32>
    %26 = arith.index_cast %c0_i32_4 : i32 to index
    %c0_11 = arith.constant 0 : index
    %c0_12 = arith.constant 0 : index
    %27 = vector.load %arg5[%26, %c0_11, %c0_12] : memref<8x8x128xf32, #tpu.memory_space<vmem>>, vector<1x8x128xf32>
    %28 = vector.shape_cast %27 : vector<1x8x128xf32> to vector<8x128xf32>
    %29 = vector.shape_cast %25 : vector<8x128xf32> to vector<1x8x128xf32>
    tpu.vector_store %arg5[%26, %c0_11, %c0_12], %29 {strides = array<i32>} : memref<8x8x128xf32, #tpu.memory_space<vmem>>, vector<1x8x128xf32>,
    %c1_i32 = arith.constant 1 : i32
    %30 = arith.index_cast %c1_i32 : i32 to index
    %c0_13 = arith.constant 0 : index
    %c0_14 = arith.constant 0 : index
    %31 = vector.load %arg1[%30, %c0_13, %c0_14] : memref<8x8x128xf32, #tpu.memory_space<vmem>>, vector<1x8x128xf32>
    %32 = vector.shape_cast %31 : vector<1x8x128xf32> to vector<8x128xf32>
    %33 = tpu.concatenate %32, %14 in 1 : vector<8x128xf32>, vector<8x128xf32> -> vector<8x256xf32>
    %c0_15 = arith.constant 0 : index
    %c0_16 = arith.constant 0 : index
    %34 = vector.load %arg3[%c0_15, %c0_16] : memref<256x256xf32, #tpu.memory_space<vmem>>, vector<256x256xf32>
    %cst_17 = arith.constant dense<0.000000e+00> : vector<8x256xf32>
    %35 = tpu.matmul %33, %34, %cst_17 {dimension_numbers = #tpu.dot_dimension_numbers<[1], [0], [0], [1], [0, 0, 1, 1], [], []>} : vector<8x256xf32>, vector<256x256xf32>, vector<8x256xf32> -> vector<8x256xf32>
    %36 = arith.addf %35, %5 : vector<8x256xf32>
    %37 = vector.extract_strided_slice %36 {offsets = [0, 0], sizes = [8, 128], strides = [1, 1]} : vector<8x256xf32> to vector<8x128xf32>
    %38 = vector.extract_strided_slice %36 {offsets = [0, 128], sizes = [8, 128], strides = [1, 1]} : vector<8x256xf32> to vector<8x128xf32>
    %cst_18 = arith.constant dense<0xFF800000> : vector<8xf32>
    %39 = vector.multi_reduction <maximumf>, %38, %cst_18 [1] : vector<8x128xf32> to vector<8xf32>
    %40 = vector.shape_cast %39 : vector<8xf32> to vector<8x1xf32>
    %41 = vector.broadcast %40 : vector<8x1xf32> to vector<8x128xf32>
    %42 = arith.subf %38, %41 : vector<8x128xf32>
    %43 = math.exp %42 : vector<8x128xf32>
    %cst_19 = arith.constant dense<0.000000e+00> : vector<8xf32>
    %44 = vector.multi_reduction <add>, %43, %cst_19 [1] : vector<8x128xf32> to vector<8xf32>
    %45 = vector.shape_cast %44 : vector<8xf32> to vector<8x1xf32>
    %46 = math.log %45 : vector<8x1xf32>
    %47 = vector.broadcast %46 : vector<8x1xf32> to vector<8x128xf32>
    %48 = arith.subf %42, %47 : vector<8x128xf32>
    %49 = arith.index_cast %c1_i32 : i32 to index
    %c0_20 = arith.constant 0 : index
    %c0_21 = arith.constant 0 : index
    %50 = vector.load %arg5[%49, %c0_20, %c0_21] : memref<8x8x128xf32, #tpu.memory_space<vmem>>, vector<1x8x128xf32>
    %51 = vector.shape_cast %50 : vector<1x8x128xf32> to vector<8x128xf32>
    %52 = vector.shape_cast %48 : vector<8x128xf32> to vector<1x8x128xf32>
    tpu.vector_store %arg5[%49, %c0_20, %c0_21], %52 {strides = array<i32>} : memref<8x8x128xf32, #tpu.memory_space<vmem>>, vector<1x8x128xf32>,
    %c2_i32 = arith.constant 2 : i32
    %53 = arith.index_cast %c2_i32 : i32 to index
    %c0_22 = arith.constant 0 : index
    %c0_23 = arith.constant 0 : index
    %54 = vector.load %arg1[%53, %c0_22, %c0_23] : memref<8x8x128xf32, #tpu.memory_space<vmem>>, vector<1x8x128xf32>
    %55 = vector.shape_cast %54 : vector<1x8x128xf32> to vector<8x128xf32>
    %56 = tpu.concatenate %55, %37 in 1 : vector<8x128xf32>, vector<8x128xf32> -> vector<8x256xf32>
    %c0_24 = arith.constant 0 : index
    %c0_25 = arith.constant 0 : index
    %57 = vector.load %arg3[%c0_24, %c0_25] : memref<256x256xf32, #tpu.memory_space<vmem>>, vector<256x256xf32>
    %cst_26 = arith.constant dense<0.000000e+00> : vector<8x256xf32>
    %58 = tpu.matmul %56, %57, %cst_26 {dimension_numbers = #tpu.dot_dimension_numbers<[1], [0], [0], [1], [0, 0, 1, 1], [], []>} : vector<8x256xf32>, vector<256x256xf32>, vector<8x256xf32> -> vector<8x256xf32>
    %59 = arith.addf %58, %5 : vector<8x256xf32>
    %60 = vector.extract_strided_slice %59 {offsets = [0, 0], sizes = [8, 128], strides = [1, 1]} : vector<8x256xf32> to vector<8x128xf32>
    %61 = vector.extract_strided_slice %59 {offsets = [0, 128], sizes = [8, 128], strides = [1, 1]} : vector<8x256xf32> to vector<8x128xf32>
    %cst_27 = arith.constant dense<0xFF800000> : vector<8xf32>
    %62 = vector.multi_reduction <maximumf>, %61, %cst_27 [1] : vector<8x128xf32> to vector<8xf32>
    %63 = vector.shape_cast %62 : vector<8xf32> to vector<8x1xf32>
    %64 = vector.broadcast %63 : vector<8x1xf32> to vector<8x128xf32>
    %65 = arith.subf %61, %64 : vector<8x128xf32>
    %66 = math.exp %65 : vector<8x128xf32>
    %cst_28 = arith.constant dense<0.000000e+00> : vector<8xf32>
    %67 = vector.multi_reduction <add>, %66, %cst_28 [1] : vector<8x128xf32> to vector<8xf32>
    %68 = vector.shape_cast %67 : vector<8xf32> to vector<8x1xf32>
    %69 = math.log %68 : vector<8x1xf32>
    %70 = vector.broadcast %69 : vector<8x1xf32> to vector<8x128xf32>
    %71 = arith.subf %65, %70 : vector<8x128xf32>
    %72 = arith.index_cast %c2_i32 : i32 to index
    %c0_29 = arith.constant 0 : index
    %c0_30 = arith.constant 0 : index
    %73 = vector.load %arg5[%72, %c0_29, %c0_30] : memref<8x8x128xf32, #tpu.memory_space<vmem>>, vector<1x8x128xf32>
    %74 = vector.shape_cast %73 : vector<1x8x128xf32> to vector<8x128xf32>
    %75 = vector.shape_cast %71 : vector<8x128xf32> to vector<1x8x128xf32>
    tpu.vector_store %arg5[%72, %c0_29, %c0_30], %75 {strides = array<i32>} : memref<8x8x128xf32, #tpu.memory_space<vmem>>, vector<1x8x128xf32>,
    %c3_i32 = arith.constant 3 : i32
    %76 = arith.index_cast %c3_i32 : i32 to index
    %c0_31 = arith.constant 0 : index
    %c0_32 = arith.constant 0 : index
    %77 = vector.load %arg1[%76, %c0_31, %c0_32] : memref<8x8x128xf32, #tpu.memory_space<vmem>>, vector<1x8x128xf32>
    %78 = vector.shape_cast %77 : vector<1x8x128xf32> to vector<8x128xf32>
    %79 = tpu.concatenate %78, %60 in 1 : vector<8x128xf32>, vector<8x128xf32> -> vector<8x256xf32>
    %c0_33 = arith.constant 0 : index
    %c0_34 = arith.constant 0 : index
    %80 = vector.load %arg3[%c0_33, %c0_34] : memref<256x256xf32, #tpu.memory_space<vmem>>, vector<256x256xf32>
    %cst_35 = arith.constant dense<0.000000e+00> : vector<8x256xf32>
    %81 = tpu.matmul %79, %80, %cst_35 {dimension_numbers = #tpu.dot_dimension_numbers<[1], [0], [0], [1], [0, 0, 1, 1], [], []>} : vector<8x256xf32>, vector<256x256xf32>, vector<8x256xf32> -> vector<8x256xf32>
    %82 = arith.addf %81, %5 : vector<8x256xf32>
    %83 = vector.extract_strided_slice %82 {offsets = [0, 0], sizes = [8, 128], strides = [1, 1]} : vector<8x256xf32> to vector<8x128xf32>
    %84 = vector.extract_strided_slice %82 {offsets = [0, 128], sizes = [8, 128], strides = [1, 1]} : vector<8x256xf32> to vector<8x128xf32>
    %cst_36 = arith.constant dense<0xFF800000> : vector<8xf32>
    %85 = vector.multi_reduction <maximumf>, %84, %cst_36 [1] : vector<8x128xf32> to vector<8xf32>
    %86 = vector.shape_cast %85 : vector<8xf32> to vector<8x1xf32>
    %87 = vector.broadcast %86 : vector<8x1xf32> to vector<8x128xf32>
    %88 = arith.subf %84, %87 : vector<8x128xf32>
    %89 = math.exp %88 : vector<8x128xf32>
    %cst_37 = arith.constant dense<0.000000e+00> : vector<8xf32>
    %90 = vector.multi_reduction <add>, %89, %cst_37 [1] : vector<8x128xf32> to vector<8xf32>
    %91 = vector.shape_cast %90 : vector<8xf32> to vector<8x1xf32>
    %92 = math.log %91 : vector<8x1xf32>
    %93 = vector.broadcast %92 : vector<8x1xf32> to vector<8x128xf32>
    %94 = arith.subf %88, %93 : vector<8x128xf32>
    %95 = arith.index_cast %c3_i32 : i32 to index
    %c0_38 = arith.constant 0 : index
    %c0_39 = arith.constant 0 : index
    %96 = vector.load %arg5[%95, %c0_38, %c0_39] : memref<8x8x128xf32, #tpu.memory_space<vmem>>, vector<1x8x128xf32>
    %97 = vector.shape_cast %96 : vector<1x8x128xf32> to vector<8x128xf32>
    %98 = vector.shape_cast %94 : vector<8x128xf32> to vector<1x8x128xf32>
    tpu.vector_store %arg5[%95, %c0_38, %c0_39], %98 {strides = array<i32>} : memref<8x8x128xf32, #tpu.memory_space<vmem>>, vector<1x8x128xf32>,
    %c4_i32 = arith.constant 4 : i32
    %99 = arith.index_cast %c4_i32 : i32 to index
    %c0_40 = arith.constant 0 : index
    %c0_41 = arith.constant 0 : index
    %100 = vector.load %arg1[%99, %c0_40, %c0_41] : memref<8x8x128xf32, #tpu.memory_space<vmem>>, vector<1x8x128xf32>
    %101 = vector.shape_cast %100 : vector<1x8x128xf32> to vector<8x128xf32>
    %102 = tpu.concatenate %101, %83 in 1 : vector<8x128xf32>, vector<8x128xf32> -> vector<8x256xf32>
    %c0_42 = arith.constant 0 : index
    %c0_43 = arith.constant 0 : index
    %103 = vector.load %arg3[%c0_42, %c0_43] : memref<256x256xf32, #tpu.memory_space<vmem>>, vector<256x256xf32>
    %cst_44 = arith.constant dense<0.000000e+00> : vector<8x256xf32>
    %104 = tpu.matmul %102, %103, %cst_44 {dimension_numbers = #tpu.dot_dimension_numbers<[1], [0], [0], [1], [0, 0, 1, 1], [], []>} : vector<8x256xf32>, vector<256x256xf32>, vector<8x256xf32> -> vector<8x256xf32>
    %105 = arith.addf %104, %5 : vector<8x256xf32>
    %106 = vector.extract_strided_slice %105 {offsets = [0, 0], sizes = [8, 128], strides = [1, 1]} : vector<8x256xf32> to vector<8x128xf32>
    %107 = vector.extract_strided_slice %105 {offsets = [0, 128], sizes = [8, 128], strides = [1, 1]} : vector<8x256xf32> to vector<8x128xf32>
    %cst_45 = arith.constant dense<0xFF800000> : vector<8xf32>
    %108 = vector.multi_reduction <maximumf>, %107, %cst_45 [1] : vector<8x128xf32> to vector<8xf32>
    %109 = vector.shape_cast %108 : vector<8xf32> to vector<8x1xf32>
    %110 = vector.broadcast %109 : vector<8x1xf32> to vector<8x128xf32>
    %111 = arith.subf %107, %110 : vector<8x128xf32>
    %112 = math.exp %111 : vector<8x128xf32>
    %cst_46 = arith.constant dense<0.000000e+00> : vector<8xf32>
    %113 = vector.multi_reduction <add>, %112, %cst_46 [1] : vector<8x128xf32> to vector<8xf32>
    %114 = vector.shape_cast %113 : vector<8xf32> to vector<8x1xf32>
    %115 = math.log %114 : vector<8x1xf32>
    %116 = vector.broadcast %115 : vector<8x1xf32> to vector<8x128xf32>
    %117 = arith.subf %111, %116 : vector<8x128xf32>
    %118 = arith.index_cast %c4_i32 : i32 to index
    %c0_47 = arith.constant 0 : index
    %c0_48 = arith.constant 0 : index
    %119 = vector.load %arg5[%118, %c0_47, %c0_48] : memref<8x8x128xf32, #tpu.memory_space<vmem>>, vector<1x8x128xf32>
    %120 = vector.shape_cast %119 : vector<1x8x128xf32> to vector<8x128xf32>
    %121 = vector.shape_cast %117 : vector<8x128xf32> to vector<1x8x128xf32>
    tpu.vector_store %arg5[%118, %c0_47, %c0_48], %121 {strides = array<i32>} : memref<8x8x128xf32, #tpu.memory_space<vmem>>, vector<1x8x128xf32>,
    %c5_i32 = arith.constant 5 : i32
    %122 = arith.index_cast %c5_i32 : i32 to index
    %c0_49 = arith.constant 0 : index
    %c0_50 = arith.constant 0 : index
    %123 = vector.load %arg1[%122, %c0_49, %c0_50] : memref<8x8x128xf32, #tpu.memory_space<vmem>>, vector<1x8x128xf32>
    %124 = vector.shape_cast %123 : vector<1x8x128xf32> to vector<8x128xf32>
    %125 = tpu.concatenate %124, %106 in 1 : vector<8x128xf32>, vector<8x128xf32> -> vector<8x256xf32>
    %c0_51 = arith.constant 0 : index
    %c0_52 = arith.constant 0 : index
    %126 = vector.load %arg3[%c0_51, %c0_52] : memref<256x256xf32, #tpu.memory_space<vmem>>, vector<256x256xf32>
    %cst_53 = arith.constant dense<0.000000e+00> : vector<8x256xf32>
    %127 = tpu.matmul %125, %126, %cst_53 {dimension_numbers = #tpu.dot_dimension_numbers<[1], [0], [0], [1], [0, 0, 1, 1], [], []>} : vector<8x256xf32>, vector<256x256xf32>, vector<8x256xf32> -> vector<8x256xf32>
    %128 = arith.addf %127, %5 : vector<8x256xf32>
    %129 = vector.extract_strided_slice %128 {offsets = [0, 0], sizes = [8, 128], strides = [1, 1]} : vector<8x256xf32> to vector<8x128xf32>
    %130 = vector.extract_strided_slice %128 {offsets = [0, 128], sizes = [8, 128], strides = [1, 1]} : vector<8x256xf32> to vector<8x128xf32>
    %cst_54 = arith.constant dense<0xFF800000> : vector<8xf32>
    %131 = vector.multi_reduction <maximumf>, %130, %cst_54 [1] : vector<8x128xf32> to vector<8xf32>
    %132 = vector.shape_cast %131 : vector<8xf32> to vector<8x1xf32>
    %133 = vector.broadcast %132 : vector<8x1xf32> to vector<8x128xf32>
    %134 = arith.subf %130, %133 : vector<8x128xf32>
    %135 = math.exp %134 : vector<8x128xf32>
    %cst_55 = arith.constant dense<0.000000e+00> : vector<8xf32>
    %136 = vector.multi_reduction <add>, %135, %cst_55 [1] : vector<8x128xf32> to vector<8xf32>
    %137 = vector.shape_cast %136 : vector<8xf32> to vector<8x1xf32>
    %138 = math.log %137 : vector<8x1xf32>
    %139 = vector.broadcast %138 : vector<8x1xf32> to vector<8x128xf32>
    %140 = arith.subf %134, %139 : vector<8x128xf32>
    %141 = arith.index_cast %c5_i32 : i32 to index
    %c0_56 = arith.constant 0 : index
    %c0_57 = arith.constant 0 : index
    %142 = vector.load %arg5[%141, %c0_56, %c0_57] : memref<8x8x128xf32, #tpu.memory_space<vmem>>, vector<1x8x128xf32>
    %143 = vector.shape_cast %142 : vector<1x8x128xf32> to vector<8x128xf32>
    %144 = vector.shape_cast %140 : vector<8x128xf32> to vector<1x8x128xf32>
    tpu.vector_store %arg5[%141, %c0_56, %c0_57], %144 {strides = array<i32>} : memref<8x8x128xf32, #tpu.memory_space<vmem>>, vector<1x8x128xf32>,
    %c6_i32 = arith.constant 6 : i32
    %145 = arith.index_cast %c6_i32 : i32 to index
    %c0_58 = arith.constant 0 : index
    %c0_59 = arith.constant 0 : index
    %146 = vector.load %arg1[%145, %c0_58, %c0_59] : memref<8x8x128xf32, #tpu.memory_space<vmem>>, vector<1x8x128xf32>
    %147 = vector.shape_cast %146 : vector<1x8x128xf32> to vector<8x128xf32>
    %148 = tpu.concatenate %147, %129 in 1 : vector<8x128xf32>, vector<8x128xf32> -> vector<8x256xf32>
    %c0_60 = arith.constant 0 : index
    %c0_61 = arith.constant 0 : index
    %149 = vector.load %arg3[%c0_60, %c0_61] : memref<256x256xf32, #tpu.memory_space<vmem>>, vector<256x256xf32>
    %cst_62 = arith.constant dense<0.000000e+00> : vector<8x256xf32>
    %150 = tpu.matmul %148, %149, %cst_62 {dimension_numbers = #tpu.dot_dimension_numbers<[1], [0], [0], [1], [0, 0, 1, 1], [], []>} : vector<8x256xf32>, vector<256x256xf32>, vector<8x256xf32> -> vector<8x256xf32>
    %151 = arith.addf %150, %5 : vector<8x256xf32>
    %152 = vector.extract_strided_slice %151 {offsets = [0, 0], sizes = [8, 128], strides = [1, 1]} : vector<8x256xf32> to vector<8x128xf32>
    %153 = vector.extract_strided_slice %151 {offsets = [0, 128], sizes = [8, 128], strides = [1, 1]} : vector<8x256xf32> to vector<8x128xf32>
    %cst_63 = arith.constant dense<0xFF800000> : vector<8xf32>
    %154 = vector.multi_reduction <maximumf>, %153, %cst_63 [1] : vector<8x128xf32> to vector<8xf32>
    %155 = vector.shape_cast %154 : vector<8xf32> to vector<8x1xf32>
    %156 = vector.broadcast %155 : vector<8x1xf32> to vector<8x128xf32>
    %157 = arith.subf %153, %156 : vector<8x128xf32>
    %158 = math.exp %157 : vector<8x128xf32>
    %cst_64 = arith.constant dense<0.000000e+00> : vector<8xf32>
    %159 = vector.multi_reduction <add>, %158, %cst_64 [1] : vector<8x128xf32> to vector<8xf32>
    %160 = vector.shape_cast %159 : vector<8xf32> to vector<8x1xf32>
    %161 = math.log %160 : vector<8x1xf32>
    %162 = vector.broadcast %161 : vector<8x1xf32> to vector<8x128xf32>
    %163 = arith.subf %157, %162 : vector<8x128xf32>
    %164 = arith.index_cast %c6_i32 : i32 to index
    %c0_65 = arith.constant 0 : index
    %c0_66 = arith.constant 0 : index
    %165 = vector.load %arg5[%164, %c0_65, %c0_66] : memref<8x8x128xf32, #tpu.memory_space<vmem>>, vector<1x8x128xf32>
    %166 = vector.shape_cast %165 : vector<1x8x128xf32> to vector<8x128xf32>
    %167 = vector.shape_cast %163 : vector<8x128xf32> to vector<1x8x128xf32>
    tpu.vector_store %arg5[%164, %c0_65, %c0_66], %167 {strides = array<i32>} : memref<8x8x128xf32, #tpu.memory_space<vmem>>, vector<1x8x128xf32>,
    %c7_i32 = arith.constant 7 : i32
    %168 = arith.index_cast %c7_i32 : i32 to index
    %c0_67 = arith.constant 0 : index
    %c0_68 = arith.constant 0 : index
    %169 = vector.load %arg1[%168, %c0_67, %c0_68] : memref<8x8x128xf32, #tpu.memory_space<vmem>>, vector<1x8x128xf32>
    %170 = vector.shape_cast %169 : vector<1x8x128xf32> to vector<8x128xf32>
    %171 = tpu.concatenate %170, %152 in 1 : vector<8x128xf32>, vector<8x128xf32> -> vector<8x256xf32>
    %c0_69 = arith.constant 0 : index
    %c0_70 = arith.constant 0 : index
    %172 = vector.load %arg3[%c0_69, %c0_70] : memref<256x256xf32, #tpu.memory_space<vmem>>, vector<256x256xf32>
    %cst_71 = arith.constant dense<0.000000e+00> : vector<8x256xf32>
    %173 = tpu.matmul %171, %172, %cst_71 {dimension_numbers = #tpu.dot_dimension_numbers<[1], [0], [0], [1], [0, 0, 1, 1], [], []>} : vector<8x256xf32>, vector<256x256xf32>, vector<8x256xf32> -> vector<8x256xf32>
    %174 = arith.addf %173, %5 : vector<8x256xf32>
    %175 = vector.extract_strided_slice %174 {offsets = [0, 0], sizes = [8, 128], strides = [1, 1]} : vector<8x256xf32> to vector<8x128xf32>
    %176 = vector.extract_strided_slice %174 {offsets = [0, 128], sizes = [8, 128], strides = [1, 1]} : vector<8x256xf32> to vector<8x128xf32>
    %cst_72 = arith.constant dense<0xFF800000> : vector<8xf32>
    %177 = vector.multi_reduction <maximumf>, %176, %cst_72 [1] : vector<8x128xf32> to vector<8xf32>
    %178 = vector.shape_cast %177 : vector<8xf32> to vector<8x1xf32>
    %179 = vector.broadcast %178 : vector<8x1xf32> to vector<8x128xf32>
    %180 = arith.subf %176, %179 : vector<8x128xf32>
    %181 = math.exp %180 : vector<8x128xf32>
    %cst_73 = arith.constant dense<0.000000e+00> : vector<8xf32>
    %182 = vector.multi_reduction <add>, %181, %cst_73 [1] : vector<8x128xf32> to vector<8xf32>
    %183 = vector.shape_cast %182 : vector<8xf32> to vector<8x1xf32>
    %184 = math.log %183 : vector<8x1xf32>
    %185 = vector.broadcast %184 : vector<8x1xf32> to vector<8x128xf32>
    %186 = arith.subf %180, %185 : vector<8x128xf32>
    %187 = arith.index_cast %c7_i32 : i32 to index
    %c0_74 = arith.constant 0 : index
    %c0_75 = arith.constant 0 : index
    %188 = vector.load %arg5[%187, %c0_74, %c0_75] : memref<8x8x128xf32, #tpu.memory_space<vmem>>, vector<1x8x128xf32>
    %189 = vector.shape_cast %188 : vector<1x8x128xf32> to vector<8x128xf32>
    %190 = vector.shape_cast %186 : vector<8x128xf32> to vector<1x8x128xf32>
    tpu.vector_store %arg5[%187, %c0_74, %c0_75], %190 {strides = array<i32>} : memref<8x8x128xf32, #tpu.memory_space<vmem>>, vector<1x8x128xf32>,
    %c8_i32 = arith.constant 8 : i32
    %c0_76 = arith.constant 0 : index
    %c0_77 = arith.constant 0 : index
    %191 = vector.load %arg6[%c0_76, %c0_77] : memref<8x128xf32, #tpu.memory_space<vmem>>, vector<8x128xf32>
    tpu.vector_store %arg6[%c0_76, %c0_77], %175 {strides = array<i32>} : memref<8x128xf32, #tpu.memory_space<vmem>>, vector<8x128xf32>,
    return
  }
  func.func @transform_0(%arg0: i32) -> (i32, i32, i32) {
    %c0_i32 = arith.constant 0 : i32
    %c0_i32_0 = arith.constant 0 : i32
    %c0_i32_1 = arith.constant 0 : i32
    return %arg0, %c0_i32, %c0_i32_0 : i32, i32, i32
  }
  func.func @transform_1(%arg0: i32) -> (i32, i32) {
    %c0_i32 = arith.constant 0 : i32
    %c0_i32_0 = arith.constant 0 : i32
    %c0_i32_1 = arith.constant 0 : i32
    return %c0_i32, %c0_i32_0 : i32, i32
  }
  func.func @transform_2(%arg0: i32) -> (i32, i32) {
    %c0_i32 = arith.constant 0 : i32
    %c0_i32_0 = arith.constant 0 : i32
    %c0_i32_1 = arith.constant 0 : i32
    return %c0_i32, %c0_i32_0 : i32, i32
  }
  func.func @transform_3(%arg0: i32) -> (i32, i32) {
    %c0_i32 = arith.constant 0 : i32
    %c0_i32_0 = arith.constant 0 : i32
    %c0_i32_1 = arith.constant 0 : i32
    return %c0_i32, %c0_i32_0 : i32, i32
  }
  func.func @transform_4(%arg0: i32) -> (i32, i32, i32) {
    %c0_i32 = arith.constant 0 : i32
    %c0_i32_0 = arith.constant 0 : i32
    %c0_i32_1 = arith.constant 0 : i32
    return %arg0, %c0_i32, %c0_i32_0 : i32, i32, i32
  }
  func.func @transform_5(%arg0: i32) -> (i32, i32) {
    %c0_i32 = arith.constant 0 : i32
    %c0_i32_0 = arith.constant 0 : i32
    %c0_i32_1 = arith.constant 0 : i32
    return %c0_i32, %c0_i32_0 : i32, i32
  }
}

</mosaic_0001>

<bundles_post_ra>
// kernel: rnn_forward.1
= control target key start
LH: loop header
LB: loop body
LE: loop exit
PB: predicated region body
PF: predicated region fallthrough
CT: control target
= control target key end

     0   :  { %11 = vsyncpa [#allocation3], 0  ;;  %s1837_s18 = smov [#allocation2]   ;;  %s2359_s0 = inlined_call_operand.vmem [shape: f32[8,8,128], index: 0, kind: input, shape index: {}]   ;;  %s2360_s1 = inlined_call_operand.vmem [shape: f32[8,128], index: 1, kind: input, shape index: {}]   ;;  %s2361_s2 = inlined_call_operand.hbm [shape: f32[256,256], index: 2, kind: input, shape index: {}]   ;;  %s2362_s3 = inlined_call_operand.vmem [shape: f32[1,256], index: 3, kind: input, shape index: {}]   ;;  %s2363_s4 = inlined_call_operand.vmem [shape: f32[8,8,128], index: 4, kind: output, shape index: {0}]   ;;  %s2364_s5 = inlined_call_operand.vmem [shape: f32[8,128], index: 5, kind: output, shape index: {1}]  }
   0x1   :  { %s21_s19 = sshll.u32 %s1837_s18, 4  ;;  %s1813_s22 = scalar_lea.hbm %s2361_s2, 8192  ;;  %s22_s19 = int_to_ptr.vmem [resolvable:$true] %s21_s19 }
   0x2   :  { %p1814_p0 = scmp.ne.s32.totalorder %s2361_s2, %s1813_s22  ;;  %p1817_p1 = scmp.lt.u32.totalorder %s1813_s22, %s2361_s2 }
   0x4   :  { %p1819_p2 = pnand %p1817_p1, %p1814_p0 }
   0x6   :  { %1822 = shalt.err (!%p1819_p2)
}
   0x7   :  { %s1823_s27 = scalar_lea.vmem %s22_s19, 8192  ;;  %p1828_p4 = scmp.lt.s32.totalorder %s22_s19, %s22_s19 }
   0x8   :  { %p1824_p3 = scmp.ne.s32.totalorder %s22_s19, %s1823_s27  ;;  %p1829_p5 = scmp.lt.s32.totalorder %s1823_s27, %s1823_s27 }
   0xa   :  { %p1830_p6 = por %p1829_p5, %p1828_p4 }
   0xc   :  { %p1831_p7 = pnand %p1830_p6, %p1824_p3 }
   0xe   :  { %1834 = shalt.err (!%p1831_p7)
}
   0xf   :  { %s1838_s28 = smov 256   ;;  %s1839_s29 = smov 16  }
  0x10   :  { %27 = dma.hbm_to_vmem [thread:$0]  %s2361_s2, 8192, %s22_s19, [#allocation3], %s1838_s28, %s1838_s28, %s1839_s29  }
  0x11   :  { %1835 = dma.done.wait [#allocation3], 8192  }
  0x12   :  { %1836 = vsyncadd [#allocation3], 4294959104  ;;  %v54_v0 = vld [vmem:[#allocation2 + $0x8] sm:$0xff]  ;;  %v56_v1 = vld [vmem:[#allocation2 + $0x18] sm:$0xff] }
  0x13   :  { %v53_v2 = vld [vmem:[#allocation2] sm:$0xff]  ;;  %v1882_v3 = vpack.c.bf16 %v56_v1, %v54_v0  ;;  %v55_v4 = vld [vmem:[#allocation2 + $0x10] sm:$0xff]  ;;  %v58_v5 = vld [vmem:[#allocation2 + $0x28] sm:$0xff] }
  0x14   :  { %v60_v6 = vld [vmem:[#allocation2 + $0x38] sm:$0xff]  ;;  %v1884_v7 = vpack.c.bf16 %v55_v4, %v53_v2  ;;  %v57_v9 = vld [vmem:[#allocation2 + $0x20] sm:$0xff]  ;;  %v59_v10 = vld [vmem:[#allocation2 + $0x30] sm:$0xff] }
  0x15   :  { %v1886_v8 = vpack.c.bf16 %v60_v6, %v58_v5  ;;  %v62_v11 = vld [vmem:[#allocation2 + $0x48] sm:$0xff]  ;;  %1267 = vmatprep.subr.bf16.mxu0 %v1882_v3  ;;  %v64_v12 = vld [vmem:[#allocation2 + $0x58] sm:$0xff]  ;;  %1331 = vmatprep.subr.bf16.mxu1 %v1882_v3  ;;  %v1891_v13 = vpack.c.bf16 %v59_v10, %v57_v9  ;;  %v61_v15 = vld [vmem:[#allocation2 + $0x40] sm:$0xff] }
  0x16   :  { %1269 = vmatpush1.bf16.msra.mxu0 %v1884_v7  ;;  %1333 = vmatpush1.bf16.msra.mxu1 %v1884_v7  ;;  %v1895_v14 = vpack.c.bf16 %v64_v12, %v62_v11  ;;  %v63_v16 = vld [vmem:[#allocation2 + $0x50] sm:$0xff]  ;;  %v66_v17 = vld [vmem:[#allocation2 + $0x68] sm:$0xff]  ;;  %v68_v18 = vld [vmem:[#allocation2 + $0x78] sm:$0xff] }
  0x17   :  { %1271 = vmatprep.subr.bf16.mxu0 %v1886_v8  ;;  %1335 = vmatprep.subr.bf16.mxu1 %v1886_v8  ;;  %v1899_v19 = vpack.c.bf16 %v63_v16, %v61_v15  ;;  %v1903_v20 = vpack.c.bf16 %v68_v18, %v66_v17  ;;  %v65_v21 = vld [vmem:[#allocation2 + $0x60] sm:$0xff]  ;;  %v67_v22 = vld [vmem:[#allocation2 + $0x70] sm:$0xff]  ;;  %v70_v23 = vld [vmem:[#allocation2 + $0x88] sm:$0xff] }
  0x18   :  { %v72_v24 = vld [vmem:[#allocation2 + $0x98] sm:$0xff]  ;;  %v1907_v25 = vpack.c.bf16 %v67_v22, %v65_v21  ;;  %v69_v27 = vld [vmem:[#allocation2 + $0x80] sm:$0xff]  ;;  %v71_v28 = vld [vmem:[#allocation2 + $0x90] sm:$0xff] }
  0x19   :  { %v1911_v26 = vpack.c.bf16 %v72_v24, %v70_v23  ;;  %v74_v29 = vld [vmem:[#allocation2 + $0xa8] sm:$0xff]  ;;  %v76_v30 = vld [vmem:[#allocation2 + $0xb8] sm:$0xff]  ;;  %v1915_v31 = vpack.c.bf16 %v71_v28, %v69_v27  ;;  %v73_v33 = vld [vmem:[#allocation2 + $0xa0] sm:$0xff] }
  0x1a   :  { %1273 = vmatpush1.bf16.msra.mxu0 %v1891_v13  ;;  %1337 = vmatpush1.bf16.msra.mxu1 %v1891_v13  ;;  %v1919_v32 = vpack.c.bf16 %v76_v30, %v74_v29  ;;  %v75_v34 = vld [vmem:[#allocation2 + $0xb0] sm:$0xff]  ;;  %v78_v35 = vld [vmem:[#allocation2 + $0xc8] sm:$0xff]  ;;  %v80_v36 = vld [vmem:[#allocation2 + $0xd8] sm:$0xff] }
  0x1b   :  { %1275 = vmatprep.subr.bf16.mxu0 %v1895_v14  ;;  %1339 = vmatprep.subr.bf16.mxu1 %v1895_v14  ;;  %v1923_v37 = vpack.c.bf16 %v75_v34, %v73_v33  ;;  %v1927_v38 = vpack.c.bf16 %v80_v36, %v78_v35  ;;  %v77_v39 = vld [vmem:[#allocation2 + $0xc0] sm:$0xff]  ;;  %v79_v40 = vld [vmem:[#allocation2 + $0xd0] sm:$0xff]  ;;  %v82_v42 = vld [vmem:[#allocation2 + $0xe8] sm:$0xff] }
  0x1c   :  { %v37_v41 = vld [vmem:[%s2360_s1] sm:$0xff]  ;;  %v84_v43 = vld [vmem:[#allocation2 + $0xf8] sm:$0xff]  ;;  %v1934_v44 = vpack.c.bf16 %v79_v40, %v77_v39  ;;  %v83_v47 = vld [vmem:[#allocation2 + $0xf0] sm:$0xff] }
  0x1d   :  { %181 = vmatprep.mubr.f32.mxu0 %v37_v41  ;;  %v1938_v45 = vpack.c.bf16 %v84_v43, %v82_v42  ;;  %v81_v46 = vld [vmem:[#allocation2 + $0xe0] sm:$0xff]  ;;  %v86_v48 = vld [vmem:[#allocation2 + $0x108] sm:$0xff]  ;;  %v88_v49 = vld [vmem:[#allocation2 + $0x118] sm:$0xff] }
  0x1e   :  { %1277 = vmatpush1.bf16.msra.mxu0 %v1899_v19  ;;  %1341 = vmatpush1.bf16.msra.mxu1 %v1899_v19  ;;  %v1942_v50 = vpack.c.bf16 %v83_v47, %v81_v46  ;;  %v1946_v51 = vpack.c.bf16 %v88_v49, %v86_v48  ;;  %v85_v52 = vld [vmem:[#allocation2 + $0x100] sm:$0xff]  ;;  %v87_v53 = vld [vmem:[#allocation2 + $0x110] sm:$0xff]  ;;  %v90_v54 = vld [vmem:[#allocation2 + $0x128] sm:$0xff] }
  0x1f   :  { %1279 = vmatprep.subr.bf16.mxu0 %v1903_v20  ;;  %1343 = vmatprep.subr.bf16.mxu1 %v1903_v20  ;;  %v92_v55 = vld [vmem:[#allocation2 + $0x138] sm:$0xff]  ;;  %v1950_v56 = vpack.c.bf16 %v87_v53, %v85_v52  ;;  %v89_v58 = vld [vmem:[#allocation2 + $0x120] sm:$0xff]  ;;  %v91_v59 = vld [vmem:[#allocation2 + $0x130] sm:$0xff] }
  0x20   :  { %v1954_v57 = vpack.c.bf16 %v92_v55, %v90_v54  ;;  %v94_v60 = vld [vmem:[#allocation2 + $0x148] sm:$0xff]  ;;  %v96_v61 = vld [vmem:[#allocation2 + $0x158] sm:$0xff]  ;;  %v1958_v62 = vpack.c.bf16 %v91_v59, %v89_v58  ;;  %v93_v0 = vld [vmem:[#allocation2 + $0x140] sm:$0xff] }
  0x21   :  { %v1962_v63 = vpack.c.bf16 %v96_v61, %v94_v60  ;;  %v95_v1 = vld [vmem:[#allocation2 + $0x150] sm:$0xff]  ;;  %v98_v2 = vld [vmem:[#allocation2 + $0x168] sm:$0xff]  ;;  %v100_v4 = vld [vmem:[#allocation2 + $0x178] sm:$0xff] }
  0x22   :  { %1281 = vmatpush1.bf16.msra.mxu0 %v1907_v25  ;;  %1345 = vmatpush1.bf16.msra.mxu1 %v1907_v25  ;;  %v1966_v5 = vpack.c.bf16 %v95_v1, %v93_v0  ;;  %v1970_v6 = vpack.c.bf16 %v100_v4, %v98_v2  ;;  %v97_v9 = vld [vmem:[#allocation2 + $0x160] sm:$0xff]  ;;  %v99_v10 = vld [vmem:[#allocation2 + $0x170] sm:$0xff]  ;;  %v102_v11 = vld [vmem:[#allocation2 + $0x188] sm:$0xff] }
  0x23   :  { %1283 = vmatprep.subr.bf16.mxu0 %v1911_v26  ;;  %1347 = vmatprep.subr.bf16.mxu1 %v1911_v26  ;;  %v104_v12 = vld [vmem:[#allocation2 + $0x198] sm:$0xff]  ;;  %v1974_v15 = vpack.c.bf16 %v99_v10, %v97_v9  ;;  %v101_v17 = vld [vmem:[#allocation2 + $0x180] sm:$0xff]  ;;  %v103_v18 = vld [vmem:[#allocation2 + $0x190] sm:$0xff] }
  0x24   :  { %v1978_v16 = vpack.c.bf16 %v104_v12, %v102_v11  ;;  %v106_v21 = vld [vmem:[#allocation2 + $0x1a8] sm:$0xff]  ;;  %v108_v22 = vld [vmem:[#allocation2 + $0x1b8] sm:$0xff]  ;;  %v1982_v23 = vpack.c.bf16 %v103_v18, %v101_v17  ;;  %v105_v27 = vld [vmem:[#allocation2 + $0x1a0] sm:$0xff] }
  0x25   :  { %v1986_v24 = vpack.c.bf16 %v108_v22, %v106_v21  ;;  %v107_v28 = vld [vmem:[#allocation2 + $0x1b0] sm:$0xff]  ;;  %v110_v29 = vld [vmem:[#allocation2 + $0x1c8] sm:$0xff]  ;;  %v112_v30 = vld [vmem:[#allocation2 + $0x1d8] sm:$0xff] }
  0x26   :  { %1285 = vmatpush1.bf16.msra.mxu0 %v1915_v31  ;;  %1349 = vmatpush1.bf16.msra.mxu1 %v1915_v31  ;;  %v1990_v33 = vpack.c.bf16 %v107_v28, %v105_v27  ;;  %v1994_v34 = vpack.c.bf16 %v112_v30, %v110_v29  ;;  %v109_v35 = vld [vmem:[#allocation2 + $0x1c0] sm:$0xff]  ;;  %v111_v36 = vld [vmem:[#allocation2 + $0x1d0] sm:$0xff]  ;;  %v114_v39 = vld [vmem:[#allocation2 + $0x1e8] sm:$0xff] }
  0x27   :  { %1287 = vmatprep.subr.bf16.mxu0 %v1919_v32  ;;  %1351 = vmatprep.subr.bf16.mxu1 %v1919_v32  ;;  %v116_v40 = vld [vmem:[#allocation2 + $0x1f8] sm:$0xff]  ;;  %v1998_v41 = vpack.c.bf16 %v111_v36, %v109_v35  ;;  %v113_v43 = vld [vmem:[#allocation2 + $0x1e0] sm:$0xff]  ;;  %v115_v46 = vld [vmem:[#allocation2 + $0x1f0] sm:$0xff] }
  0x28   :  { %v2002_v42 = vpack.c.bf16 %v116_v40, %v114_v39  ;;  %v2006_v47 = vpack.c.bf16 %v115_v46, %v113_v43  ;;  %v52_v48 = vld [vmem:[%s2359_s0] sm:$0xff]  ;;  %v1252_v0 = vld [vmem:[%s2359_s0 + $0x8] sm:$0xff]  ;;  %v654_v2 = vld [vmem:[#allocation2 + $0x30] sm:$0xff] }
  0x29   :  { %v39_v53 = vld [vmem:[%s2362_s3] sm:$0x3]  ;;  %v657_v4 = vld [vmem:[#allocation2 + $0x48] sm:$0xff]  ;;  %v658_v11 = vld [vmem:[#allocation2 + $0x50] sm:$0xff] }
  0x2a   :  { %1289 = vmatpush1.bf16.msra.mxu0 %v1923_v37  ;;  %1353 = vmatpush1.bf16.msra.mxu1 %v1923_v37  ;;  %v656_v10 = vld [vmem:[#allocation2 + $0x40] sm:$0xff]  ;;  %v661_v12 = vld [vmem:[#allocation2 + $0x68] sm:$0xff]  ;;  %v662_v21 = vld [vmem:[#allocation2 + $0x70] sm:$0xff] }
  0x2b   :  { %1291 = vmatprep.subr.bf16.mxu0 %v1927_v38  ;;  %1355 = vmatprep.subr.bf16.mxu1 %v1927_v38  ;;  %v660_v18 = vld [vmem:[#allocation2 + $0x60] sm:$0xff]  ;;  %v665_v22 = vld [vmem:[#allocation2 + $0x88] sm:$0xff]  ;;  %v666_v29 = vld [vmem:[#allocation2 + $0x90] sm:$0xff] }
  0x2c   :  { %v664_v28 = vld [vmem:[#allocation2 + $0x80] sm:$0xff]  ;;  %v669_v30 = vld [vmem:[#allocation2 + $0xa8] sm:$0xff]  ;;  %v670_v39 = vld [vmem:[#allocation2 + $0xb0] sm:$0xff] }
  0x2d   :  { %v668_v36 = vld [vmem:[#allocation2 + $0xa0] sm:$0xff]  ;;  %v673_v40 = vld [vmem:[#allocation2 + $0xc8] sm:$0xff] }
  0x2e   :  { %1293 = vmatpush1.bf16.msra.mxu0 %v1934_v44  ;;  %1357 = vmatpush1.bf16.msra.mxu1 %v1934_v44  ;;  %v672_v46 = vld [vmem:[#allocation2 + $0xc0] sm:$0xff] }
  0x2f   :  { %1295 = vmatprep.subr.bf16.mxu0 %v1938_v45  ;;  %1359 = vmatprep.subr.bf16.mxu1 %v1938_v45 }
  0x32   :  { %1297 = vmatpush1.bf16.msra.mxu0 %v1942_v50  ;;  %1361 = vmatpush1.bf16.msra.mxu1 %v1942_v50 }
  0x33   :  { %1299 = vmatprep.subr.bf16.mxu0 %v1946_v51  ;;  %1363 = vmatprep.subr.bf16.mxu1 %v1946_v51 }
  0x36   :  { %1301 = vmatpush1.bf16.msra.mxu0 %v1950_v56  ;;  %1365 = vmatpush1.bf16.msra.mxu1 %v1950_v56 }
  0x37   :  { %1303 = vmatprep.subr.bf16.mxu0 %v1954_v57  ;;  %1367 = vmatprep.subr.bf16.mxu1 %v1954_v57 }
  0x3a   :  { %1305 = vmatpush1.bf16.msra.mxu0 %v1958_v62  ;;  %1369 = vmatpush1.bf16.msra.mxu1 %v1958_v62 }
  0x3b   :  { %1307 = vmatprep.subr.bf16.mxu0 %v1962_v63  ;;  %1371 = vmatprep.subr.bf16.mxu1 %v1962_v63 }
  0x3e   :  { %1309 = vmatpush1.bf16.msra.mxu0 %v1966_v5  ;;  %1373 = vmatpush1.bf16.msra.mxu1 %v1966_v5 }
  0x3f   :  { %1311 = vmatprep.subr.bf16.mxu0 %v1970_v6  ;;  %1375 = vmatprep.subr.bf16.mxu1 %v1970_v6 }
  0x42   :  { %1313 = vmatpush1.bf16.msra.mxu0 %v1974_v15  ;;  %1377 = vmatpush1.bf16.msra.mxu1 %v1974_v15 }
  0x43   :  { %1315 = vmatprep.subr.bf16.mxu0 %v1978_v16  ;;  %1379 = vmatprep.subr.bf16.mxu1 %v1978_v16 }
  0x46   :  { %1317 = vmatpush1.bf16.msra.mxu0 %v1982_v23  ;;  %1381 = vmatpush1.bf16.msra.mxu1 %v1982_v23 }
  0x47   :  { %1319 = vmatprep.subr.bf16.mxu0 %v1986_v24  ;;  %1383 = vmatprep.subr.bf16.mxu1 %v1986_v24 }
  0x4a   :  { %1321 = vmatpush1.bf16.msra.mxu0 %v1990_v33  ;;  %1385 = vmatpush1.bf16.msra.mxu1 %v1990_v33 }
  0x4b   :  { %1323 = vmatprep.subr.bf16.mxu0 %v1994_v34  ;;  %1387 = vmatprep.subr.bf16.mxu1 %v1994_v34 }
  0x4e   :  { %1325 = vmatpush1.bf16.msra.mxu0 %v1998_v41  ;;  %1389 = vmatpush1.bf16.msra.mxu1 %v1998_v41 }
  0x4f   :  { %1327 = vmatprep.subr.bf16.mxu0 %v2002_v42  ;;  %1391 = vmatprep.subr.bf16.mxu1 %v2002_v42 }
  0x52   :  { %1329 = vmatpush1.bf16.msra.mxu0 %v2006_v47  ;;  %1393 = vmatpush1.bf16.msra.mxu1 %v2006_v47 }
  0x53   :  { %1395 = vmatprep.subr.bf16.mxu0 %v1882_v3  ;;  %1459 = vmatprep.subr.bf16.mxu1 %v1882_v3  ;;  %v41_v3 = vlaneseq }
  0x55   :  { %182 = vmatmul.mubr.f32.vlgmr.msra.gmra.mrb[0].mxu0 %v52_v48  ;;  %v42_v49 = vshrl.u32 %v41_v3, 7  ;;  %v677_v48 = vld [vmem:[#allocation2 + $0xe8] sm:$0xff]  ;;  %v679_v3 = vld [vmem:[#allocation2 + $0xf8] sm:$0xff] }
  0x56   :  { %1397 = vmatpush1.bf16.msra.mxu0 %v1884_v7 }
  0x57   :  { %1399 = vmatprep.subr.bf16.mxu0 %v1886_v8  ;;  %v43_v52 = vsub.s32 0, %v42_v49  ;;  %v47_v54 = vsub.s32 1, %v42_v49 }
  0x59   :  { %v2052_v55 = vrot.slane %v39_v53, %v43_v52  ;;  %v2054_v58 = vrot.slane %v39_v53, %v47_v54  ;;  %v2164_v52 = vpack.c.bf16 %v679_v3, %v677_v48  ;;  %v676_v53 = vld [vmem:[#allocation2 + $0xe0] sm:$0xff]  ;;  %v678_v54 = vld [vmem:[#allocation2 + $0xf0] sm:$0xff] }
  0x5a   :  { %1401 = vmatpush1.bf16.msra.mxu0 %v1891_v13  ;;  %v704_v48 = vld [vmem:[#allocation2 + $0x1c0] sm:$0xff]  ;;  %v706_v3 = vld [vmem:[#allocation2 + $0x1d0] sm:$0xff] }
  0x5b   :  { %1403 = vmatprep.subr.bf16.mxu0 %v1895_v14 }
  0x5e   :  { %1405 = vmatpush1.bf16.msra.mxu0 %v1899_v19 }
  0x5f   :  { %1407 = vmatprep.subr.bf16.mxu0 %v1903_v20 }
  0x62   :  { %1409 = vmatpush1.bf16.msra.mxu0 %v1907_v25 }
  0x63   :  { %1411 = vmatprep.subr.bf16.mxu0 %v1911_v26 }
  0x66   :  { %1413 = vmatpush1.bf16.msra.mxu0 %v1915_v31 }
  0x67   :  { %1415 = vmatprep.subr.bf16.mxu0 %v1919_v32 }
  0x6a   :  { %1417 = vmatpush1.bf16.msra.mxu0 %v1923_v37 }
  0x6b   :  { %1419 = vmatprep.subr.bf16.mxu0 %v1927_v38 }
  0x6e   :  { %1421 = vmatpush1.bf16.msra.mxu0 %v1934_v44 }
  0x6f   :  { %1423 = vmatprep.subr.bf16.mxu0 %v1938_v45 }
  0x72   :  { %1425 = vmatpush1.bf16.msra.mxu0 %v1942_v50 }
  0x73   :  { %1427 = vmatprep.subr.bf16.mxu0 %v1946_v51 }
  0x76   :  { %1429 = vmatpush1.bf16.msra.mxu0 %v1950_v56 }
  0x77   :  { %1431 = vmatprep.subr.bf16.mxu0 %v1954_v57 }
  0x7a   :  { %1433 = vmatpush1.bf16.msra.mxu0 %v1958_v62 }
  0x7b   :  { %1435 = vmatprep.subr.bf16.mxu0 %v1962_v63 }
  0x7e   :  { %1437 = vmatpush1.bf16.msra.mxu0 %v1966_v5 }
  0x7f   :  { %1439 = vmatprep.subr.bf16.mxu0 %v1970_v6 }
  0x82   :  { %1441 = vmatpush1.bf16.msra.mxu0 %v1974_v15 }
  0x83   :  { %1443 = vmatprep.subr.bf16.mxu0 %v1978_v16 }
  0x86   :  { %1445 = vmatpush1.bf16.msra.mxu0 %v1982_v23 }
  0x87   :  { %1447 = vmatprep.subr.bf16.mxu0 %v1986_v24 }
  0x8a   :  { %1449 = vmatpush1.bf16.msra.mxu0 %v1990_v33 }
  0x8b   :  { %1451 = vmatprep.subr.bf16.mxu0 %v1994_v34 }
  0x8e   :  { %1453 = vmatpush1.bf16.msra.mxu0 %v1998_v41 }
  0x8f   :  { %1455 = vmatprep.subr.bf16.mxu0 %v2002_v42 }
  0x92   :  { %1457 = vmatpush1.bf16.msra.mxu0 %v2006_v47 }
 0x128   :  { %v183_v59 = vpop.f32.mrb[0].mxu0 }
 0x129   :  { %v185_v60 = vpop.f32.mrb[1].mxu0  ;;  %v184_v61 = vadd.f32 %v183_v59, %v2052_v55  ;;  %v681_v59 = vld [vmem:[#allocation2 + $0x108] sm:$0xff] }
 0x12a   :  { %v2061_v1 = vadd.f32 %v185_v60, %v2054_v58  ;;  %v683_v60 = vld [vmem:[#allocation2 + $0x118] sm:$0xff] }
 0x12b   :  { %329 = vmatprep.mubr.f32.mxu1 %v184_v61  ;;  %v2168_v61 = vpack.c.bf16 %v678_v54, %v676_v53  ;;  %v2224_v53 = vpack.c.bf16 %v706_v3, %v704_v48  ;;  %v709_v54 = vld [vmem:[#allocation2 + $0x1e8] sm:$0xff] }
 0x12c   :  { %188 = vmax.xlane.f32.xlu0 %v2061_v1  ;;  %330 = vmatmul.mubr.f32.vlgmr.msra.gmra.mrb[0].mxu1 %v1252_v0  ;;  %v2172_v0 = vpack.c.bf16 %v683_v60, %v681_v59  ;;  %v711_v59 = vld [vmem:[#allocation2 + $0x1f8] sm:$0xff] }
 0x12d   :  { %1461 = vmatpush1.bf16.msra.mxu1 %v1884_v7  ;;  %v2231_v60 = vpack.c.bf16 %v711_v59, %v709_v54 }
 0x12e   :  { %1463 = vmatprep.subr.bf16.mxu1 %v1886_v8 }
 0x131   :  { %1465 = vmatpush1.bf16.msra.mxu1 %v1891_v13 }
 0x132   :  { %1467 = vmatprep.subr.bf16.mxu1 %v1895_v14  ;;  %v1254_v14 = vld [vmem:[%s2359_s0 + $0x10] sm:$0xff] }
 0x135   :  { %1469 = vmatpush1.bf16.msra.mxu1 %v1899_v19 }
 0x136   :  { %1471 = vmatprep.subr.bf16.mxu1 %v1903_v20 }
 0x139   :  { %1473 = vmatpush1.bf16.msra.mxu1 %v1907_v25 }
 0x13a   :  { %1475 = vmatprep.subr.bf16.mxu1 %v1911_v26 }
 0x13d   :  { %1477 = vmatpush1.bf16.msra.mxu1 %v1915_v31  ;;  %v1256_v31 = vld [vmem:[%s2359_s0 + $0x18] sm:$0xff] }
 0x13e   :  { %1479 = vmatprep.subr.bf16.mxu1 %v1919_v32 }
 0x141   :  { %1481 = vmatpush1.bf16.msra.mxu1 %v1923_v37  ;;  %v649_v37 = vld [vmem:[#allocation2 + $0x8] sm:$0xff] }
 0x142   :  { %1483 = vmatprep.subr.bf16.mxu1 %v1927_v38  ;;  %v651_v38 = vld [vmem:[#allocation2 + $0x18] sm:$0xff] }
 0x145   :  { %1485 = vmatpush1.bf16.msra.mxu1 %v1934_v44  ;;  %v648_v44 = vld [vmem:[#allocation2] sm:$0xff] }
 0x146   :  { %1487 = vmatprep.subr.bf16.mxu1 %v1938_v45  ;;  %v2111_v45 = vpack.c.bf16 %v651_v38, %v649_v37  ;;  %v689_v37 = vld [vmem:[#allocation2 + $0x148] sm:$0xff]  ;;  %v691_v38 = vld [vmem:[#allocation2 + $0x158] sm:$0xff] }
 0x148   :  { %1523 = vmatprep.subr.bf16.mxu0 %v2111_v45 }
 0x149   :  { %1489 = vmatpush1.bf16.msra.mxu1 %v1942_v50  ;;  %v650_v50 = vld [vmem:[#allocation2 + $0x10] sm:$0xff] }
 0x14a   :  { %1491 = vmatprep.subr.bf16.mxu1 %v1946_v51  ;;  %v653_v51 = vld [vmem:[#allocation2 + $0x28] sm:$0xff] }
 0x14d   :  { %1493 = vmatpush1.bf16.msra.mxu1 %v1950_v56  ;;  %v655_v56 = vld [vmem:[#allocation2 + $0x38] sm:$0xff] }
 0x14e   :  { %1495 = vmatprep.subr.bf16.mxu1 %v1954_v57  ;;  %v2113_v57 = vpack.c.bf16 %v650_v50, %v648_v44  ;;  %v2188_v50 = vpack.c.bf16 %v691_v38, %v689_v37  ;;  %v1258_v37 = vld [vmem:[%s2359_s0 + $0x20] sm:$0xff] }
 0x151   :  { %1497 = vmatpush1.bf16.msra.mxu1 %v1958_v62  ;;  %v2115_v62 = vpack.c.bf16 %v655_v56, %v653_v51  ;;  %v688_v51 = vld [vmem:[#allocation2 + $0x140] sm:$0xff]  ;;  %v690_v56 = vld [vmem:[#allocation2 + $0x150] sm:$0xff] }
 0x152   :  { %1499 = vmatprep.subr.bf16.mxu1 %v1962_v63  ;;  %v652_v63 = vld [vmem:[#allocation2 + $0x20] sm:$0xff] }
 0x155   :  { %1501 = vmatpush1.bf16.msra.mxu1 %v1966_v5  ;;  %v659_v5 = vld [vmem:[#allocation2 + $0x58] sm:$0xff] }
 0x156   :  { %1503 = vmatprep.subr.bf16.mxu1 %v1970_v6  ;;  %v2120_v6 = vpack.c.bf16 %v654_v2, %v652_v63  ;;  %v2124_v9 = vpack.c.bf16 %v659_v5, %v657_v4  ;;  %v693_v63 = vld [vmem:[#allocation2 + $0x168] sm:$0xff]  ;;  %v695_v2 = vld [vmem:[#allocation2 + $0x178] sm:$0xff]  ;;  %v2192_v4 = vpack.c.bf16 %v690_v56, %v688_v51 }
 0x157   :  { %v2196_v5 = vpack.c.bf16 %v695_v2, %v693_v63  ;;  %v1260_v63 = vld [vmem:[%s2359_s0 + $0x28] sm:$0xff] }
 0x159   :  { %1505 = vmatpush1.bf16.msra.mxu1 %v1974_v15  ;;  %v663_v15 = vld [vmem:[#allocation2 + $0x78] sm:$0xff] }
 0x15a   :  { %1507 = vmatprep.subr.bf16.mxu1 %v1978_v16  ;;  %v2128_v16 = vpack.c.bf16 %v658_v11, %v656_v10  ;;  %v2132_v17 = vpack.c.bf16 %v663_v15, %v661_v12  ;;  %v692_v10 = vld [vmem:[#allocation2 + $0x160] sm:$0xff]  ;;  %v694_v11 = vld [vmem:[#allocation2 + $0x170] sm:$0xff]  ;;  %v697_v12 = vld [vmem:[#allocation2 + $0x188] sm:$0xff] }
 0x15b   :  { %v699_v15 = vld [vmem:[#allocation2 + $0x198] sm:$0xff] }
 0x15d   :  { %1509 = vmatpush1.bf16.msra.mxu1 %v1982_v23  ;;  %v667_v23 = vld [vmem:[#allocation2 + $0x98] sm:$0xff] }
 0x15e   :  { %1511 = vmatprep.subr.bf16.mxu1 %v1986_v24  ;;  %v2136_v24 = vpack.c.bf16 %v662_v21, %v660_v18  ;;  %v2140_v27 = vpack.c.bf16 %v667_v23, %v665_v22  ;;  %v2200_v18 = vpack.c.bf16 %v694_v11, %v692_v10  ;;  %v2204_v21 = vpack.c.bf16 %v699_v15, %v697_v12  ;;  %v696_v22 = vld [vmem:[#allocation2 + $0x180] sm:$0xff]  ;;  %v698_v23 = vld [vmem:[#allocation2 + $0x190] sm:$0xff] }
 0x161   :  { %1513 = vmatpush1.bf16.msra.mxu1 %v1990_v33  ;;  %v671_v33 = vld [vmem:[#allocation2 + $0xb8] sm:$0xff] }
 0x162   :  { %1515 = vmatprep.subr.bf16.mxu1 %v1994_v34  ;;  %v2144_v34 = vpack.c.bf16 %v666_v29, %v664_v28  ;;  %v2148_v35 = vpack.c.bf16 %v671_v33, %v669_v30  ;;  %v701_v28 = vld [vmem:[#allocation2 + $0x1a8] sm:$0xff]  ;;  %v703_v29 = vld [vmem:[#allocation2 + $0x1b8] sm:$0xff]  ;;  %v2208_v30 = vpack.c.bf16 %v698_v23, %v696_v22 }
 0x163   :  { %v2212_v33 = vpack.c.bf16 %v703_v29, %v701_v28 }
 0x165   :  { %1517 = vmatpush1.bf16.msra.mxu1 %v1998_v41  ;;  %v675_v41 = vld [vmem:[#allocation2 + $0xd8] sm:$0xff] }
 0x166   :  { %1519 = vmatprep.subr.bf16.mxu1 %v2002_v42  ;;  %v2152_v42 = vpack.c.bf16 %v670_v39, %v668_v36  ;;  %v2156_v43 = vpack.c.bf16 %v675_v41, %v673_v40  ;;  %v700_v36 = vld [vmem:[#allocation2 + $0x1a0] sm:$0xff]  ;;  %v702_v39 = vld [vmem:[#allocation2 + $0x1b0] sm:$0xff]  ;;  %v705_v40 = vld [vmem:[#allocation2 + $0x1c8] sm:$0xff] }
 0x167   :  { %v707_v41 = vld [vmem:[#allocation2 + $0x1d8] sm:$0xff] }
 0x169   :  { %1521 = vmatpush1.bf16.msra.mxu1 %v2006_v47  ;;  %v674_v47 = vld [vmem:[#allocation2 + $0xd0] sm:$0xff] }
 0x16a   :  { %1587 = vmatprep.subr.bf16.mxu1 %v2111_v45  ;;  %v2160_v49 = vpack.c.bf16 %v674_v47, %v672_v46  ;;  %v2216_v46 = vpack.c.bf16 %v702_v39, %v700_v36  ;;  %v2220_v47 = vpack.c.bf16 %v707_v41, %v705_v40 }
 0x1ff   :  { %v331_v7 = vpop.f32.mrb[0].mxu1 }
 0x200   :  { %v332_v8 = vadd.f32 %v331_v7, %v2052_v55  ;;  %v333_v13 = vpop.f32.mrb[1].mxu1  ;;  %v680_v7 = vld [vmem:[#allocation2 + $0x100] sm:$0xff] }
 0x201   :  { %v2100_v19 = vadd.f32 %v333_v13, %v2054_v58  ;;  %v685_v13 = vld [vmem:[#allocation2 + $0x128] sm:$0xff] }
 0x202   :  { %478 = vmatprep.mubr.f32.mxu0 %v332_v8  ;;  %v682_v8 = vld [vmem:[#allocation2 + $0x110] sm:$0xff] }
 0x203   :  { %336 = vmax.xlane.f32.xlu0 %v2100_v19  ;;  %479 = vmatmul.mubr.f32.vlgmr.msra.gmra.mrb[2].mxu0 %v1254_v14  ;;  %v687_v14 = vld [vmem:[#allocation2 + $0x138] sm:$0xff] }
 0x204   :  { %1525 = vmatpush1.bf16.msra.mxu0 %v2113_v57 }
 0x205   :  { %1527 = vmatprep.subr.bf16.mxu0 %v2115_v62 }
 0x208   :  { %1529 = vmatpush1.bf16.msra.mxu0 %v2120_v6 }
 0x209   :  { %1531 = vmatprep.subr.bf16.mxu0 %v2124_v9 }
 0x20c   :  { %1533 = vmatpush1.bf16.msra.mxu0 %v2128_v16 }
 0x20d   :  { %1535 = vmatprep.subr.bf16.mxu0 %v2132_v17 }
 0x210   :  { %1537 = vmatpush1.bf16.msra.mxu0 %v2136_v24 }
 0x211   :  { %1539 = vmatprep.subr.bf16.mxu0 %v2140_v27 }
 0x214   :  { %1541 = vmatpush1.bf16.msra.mxu0 %v2144_v34 }
 0x215   :  { %1543 = vmatprep.subr.bf16.mxu0 %v2148_v35 }
 0x218   :  { %1545 = vmatpush1.bf16.msra.mxu0 %v2152_v42 }
 0x219   :  { %1547 = vmatprep.subr.bf16.mxu0 %v2156_v43 }
 0x21c   :  { %1549 = vmatpush1.bf16.msra.mxu0 %v2160_v49 }
 0x21d   :  { %1551 = vmatprep.subr.bf16.mxu0 %v2164_v52 }
 0x220   :  { %1553 = vmatpush1.bf16.msra.mxu0 %v2168_v61 }
 0x221   :  { %1555 = vmatprep.subr.bf16.mxu0 %v2172_v0 }
 0x2d6   :  { %v480_v20 = vpop.f32.mrb[2].mxu0 }
 0x2d7   :  { %v481_v25 = vadd.f32 %v480_v20, %v2052_v55  ;;  %v482_v26 = vpop.f32.mrb[3].mxu0  ;;  %v2176_v20 = vpack.c.bf16 %v682_v8, %v680_v7  ;;  %v708_v7 = vld [vmem:[#allocation2 + $0x1e0] sm:$0xff]  ;;  %v710_v8 = vld [vmem:[#allocation2 + $0x1f0] sm:$0xff] }
 0x2d8   :  { %v2108_v32 = vadd.f32 %v482_v26, %v2054_v58  ;;  %v684_v26 = vld [vmem:[#allocation2 + $0x120] sm:$0xff] }
 0x2d9   :  { %627 = vmatprep.mubr.f32.mxu1 %v481_v25  ;;  %v2180_v25 = vpack.c.bf16 %v687_v14, %v685_v13  ;;  %1557 = vmatpush1.bf16.msra.mxu0 %v2176_v20  ;;  %v2233_v13 = vpack.c.bf16 %v710_v8, %v708_v7 }
 0x2da   :  { %485 = vmax.xlane.f32.xlu1 %v2108_v32  ;;  %628 = vmatmul.mubr.f32.vlgmr.msra.gmra.mrb[2].mxu1 %v1256_v31  ;;  %v686_v31 = vld [vmem:[#allocation2 + $0x130] sm:$0xff] }
 0x2db   :  { %1589 = vmatpush1.bf16.msra.mxu1 %v2113_v57  ;;  %v2184_v44 = vpack.c.bf16 %v686_v31, %v684_v26  ;;  %1559 = vmatprep.subr.bf16.mxu0 %v2180_v25 }
 0x2dc   :  { %1591 = vmatprep.subr.bf16.mxu1 %v2115_v62 }
 0x2dd   :  { %1561 = vmatpush1.bf16.msra.mxu0 %v2184_v44 }
 0x2de   :  { %1563 = vmatprep.subr.bf16.mxu0 %v2188_v50 }
 0x2df   :  { %1593 = vmatpush1.bf16.msra.mxu1 %v2120_v6 }
 0x2e0   :  { %1595 = vmatprep.subr.bf16.mxu1 %v2124_v9 }
 0x2e1   :  { %1565 = vmatpush1.bf16.msra.mxu0 %v2192_v4 }
 0x2e2   :  { %1567 = vmatprep.subr.bf16.mxu0 %v2196_v5 }
 0x2e3   :  { %1597 = vmatpush1.bf16.msra.mxu1 %v2128_v16 }
 0x2e4   :  { %1599 = vmatprep.subr.bf16.mxu1 %v2132_v17 }
 0x2e5   :  { %1569 = vmatpush1.bf16.msra.mxu0 %v2200_v18 }
 0x2e6   :  { %1571 = vmatprep.subr.bf16.mxu0 %v2204_v21 }
 0x2e7   :  { %1601 = vmatpush1.bf16.msra.mxu1 %v2136_v24 }
 0x2e8   :  { %1603 = vmatprep.subr.bf16.mxu1 %v2140_v27 }
 0x2e9   :  { %1573 = vmatpush1.bf16.msra.mxu0 %v2208_v30 }
 0x2ea   :  { %1575 = vmatprep.subr.bf16.mxu0 %v2212_v33 }
 0x2eb   :  { %1605 = vmatpush1.bf16.msra.mxu1 %v2144_v34 }
 0x2ec   :  { %1607 = vmatprep.subr.bf16.mxu1 %v2148_v35 }
 0x2ed   :  { %1577 = vmatpush1.bf16.msra.mxu0 %v2216_v46 }
 0x2ee   :  { %1579 = vmatprep.subr.bf16.mxu0 %v2220_v47 }
 0x2ef   :  { %1609 = vmatpush1.bf16.msra.mxu1 %v2152_v42 }
 0x2f0   :  { %1611 = vmatprep.subr.bf16.mxu1 %v2156_v43 }
 0x2f1   :  { %1581 = vmatpush1.bf16.msra.mxu0 %v2224_v53 }
 0x2f2   :  { %1583 = vmatprep.subr.bf16.mxu0 %v2231_v60 }
 0x2f3   :  { %1613 = vmatpush1.bf16.msra.mxu1 %v2160_v49 }
 0x2f4   :  { %1615 = vmatprep.subr.bf16.mxu1 %v2164_v52 }
 0x2f5   :  { %1585 = vmatpush1.bf16.msra.mxu0 %v2233_v13 }
 0x2f6   :  { %1651 = vmatprep.subr.bf16.mxu0 %v2111_v45 }
 0x2f7   :  { %1617 = vmatpush1.bf16.msra.mxu1 %v2168_v61 }
 0x2f8   :  { %1619 = vmatprep.subr.bf16.mxu1 %v2172_v0 }
 0x2fb   :  { %1621 = vmatpush1.bf16.msra.mxu1 %v2176_v20 }
 0x2fc   :  { %1623 = vmatprep.subr.bf16.mxu1 %v2180_v25 }
 0x2ff   :  { %1625 = vmatpush1.bf16.msra.mxu1 %v2184_v44 }
 0x300   :  { %1627 = vmatprep.subr.bf16.mxu1 %v2188_v50 }
 0x303   :  { %1629 = vmatpush1.bf16.msra.mxu1 %v2192_v4 }
 0x304   :  { %1631 = vmatprep.subr.bf16.mxu1 %v2196_v5 }
 0x307   :  { %1633 = vmatpush1.bf16.msra.mxu1 %v2200_v18 }
 0x308   :  { %1635 = vmatprep.subr.bf16.mxu1 %v2204_v21 }
 0x30b   :  { %1637 = vmatpush1.bf16.msra.mxu1 %v2208_v30 }
 0x30c   :  { %1639 = vmatprep.subr.bf16.mxu1 %v2212_v33 }
 0x30f   :  { %1641 = vmatpush1.bf16.msra.mxu1 %v2216_v46 }
 0x310   :  { %1643 = vmatprep.subr.bf16.mxu1 %v2220_v47 }
 0x313   :  { %1645 = vmatpush1.bf16.msra.mxu1 %v2224_v53 }
 0x314   :  { %1647 = vmatprep.subr.bf16.mxu1 %v2231_v60 }
 0x317   :  { %1649 = vmatpush1.bf16.msra.mxu1 %v2233_v13 }
 0x318   :  { %1715 = vmatprep.subr.bf16.mxu1 %v2111_v45 }
 0x3ad   :  { %v629_v14 = vpop.f32.mrb[2].mxu1 }
 0x3ae   :  { %v630_v26 = vadd.f32 %v629_v14, %v2052_v55  ;;  %v631_v31 = vpop.f32.mrb[3].mxu1 }
 0x3af   :  { %v2246_v38 = vadd.f32 %v631_v31, %v2054_v58 }
 0x3b0   :  { %776 = vmatprep.mubr.f32.mxu0 %v630_v26 }
 0x3b1   :  { %634 = vmax.xlane.f32.xlu1 %v2246_v38  ;;  %777 = vmatmul.mubr.f32.vlgmr.msra.gmra.mrb[4].mxu0 %v1258_v37 }
 0x3b2   :  { %1653 = vmatpush1.bf16.msra.mxu0 %v2113_v57 }
 0x3b3   :  { %1655 = vmatprep.subr.bf16.mxu0 %v2115_v62 }
 0x3b6   :  { %1657 = vmatpush1.bf16.msra.mxu0 %v2120_v6 }
 0x3b7   :  { %1659 = vmatprep.subr.bf16.mxu0 %v2124_v9 }
 0x3ba   :  { %1661 = vmatpush1.bf16.msra.mxu0 %v2128_v16 }
 0x3bb   :  { %1663 = vmatprep.subr.bf16.mxu0 %v2132_v17 }
 0x3be   :  { %1665 = vmatpush1.bf16.msra.mxu0 %v2136_v24 }
 0x3bf   :  { %1667 = vmatprep.subr.bf16.mxu0 %v2140_v27 }
 0x3c2   :  { %1669 = vmatpush1.bf16.msra.mxu0 %v2144_v34 }
 0x3c3   :  { %1671 = vmatprep.subr.bf16.mxu0 %v2148_v35 }
 0x3c6   :  { %1673 = vmatpush1.bf16.msra.mxu0 %v2152_v42 }
 0x3c7   :  { %1675 = vmatprep.subr.bf16.mxu0 %v2156_v43 }
 0x3ca   :  { %1677 = vmatpush1.bf16.msra.mxu0 %v2160_v49 }
 0x3cb   :  { %1679 = vmatprep.subr.bf16.mxu0 %v2164_v52 }
 0x3ce   :  { %1681 = vmatpush1.bf16.msra.mxu0 %v2168_v61 }
 0x3cf   :  { %1683 = vmatprep.subr.bf16.mxu0 %v2172_v0 }
 0x3d2   :  { %1685 = vmatpush1.bf16.msra.mxu0 %v2176_v20 }
 0x3d3   :  { %1687 = vmatprep.subr.bf16.mxu0 %v2180_v25 }
 0x3d6   :  { %1689 = vmatpush1.bf16.msra.mxu0 %v2184_v44 }
 0x3d7   :  { %1691 = vmatprep.subr.bf16.mxu0 %v2188_v50 }
 0x3da   :  { %1693 = vmatpush1.bf16.msra.mxu0 %v2192_v4 }
 0x3db   :  { %1695 = vmatprep.subr.bf16.mxu0 %v2196_v5 }
 0x3de   :  { %1697 = vmatpush1.bf16.msra.mxu0 %v2200_v18 }
 0x3df   :  { %1699 = vmatprep.subr.bf16.mxu0 %v2204_v21 }
 0x3e2   :  { %1701 = vmatpush1.bf16.msra.mxu0 %v2208_v30 }
 0x3e3   :  { %1703 = vmatprep.subr.bf16.mxu0 %v2212_v33 }
 0x3e6   :  { %1705 = vmatpush1.bf16.msra.mxu0 %v2216_v46 }
 0x3e7   :  { %1707 = vmatprep.subr.bf16.mxu0 %v2220_v47 }
 0x3ea   :  { %1709 = vmatpush1.bf16.msra.mxu0 %v2224_v53 }
 0x3eb   :  { %1711 = vmatprep.subr.bf16.mxu0 %v2231_v60 }
 0x3ee   :  { %1713 = vmatpush1.bf16.msra.mxu0 %v2233_v13 }
 0x484   :  { %v778_v45 = vpop.f32.mrb[4].mxu0 }
 0x485   :  { %v779_v51 = vadd.f32 %v778_v45, %v2052_v55  ;;  %v780_v56 = vpop.f32.mrb[5].mxu0 }
 0x486   :  { %v781_v2 = vadd.f32 %v780_v56, %v2054_v58 }
 0x487   :  { %925 = vmatprep.mubr.f32.mxu1 %v779_v51 }
 0x488   :  { %783 = vmax.xlane.f32.xlu0 %v781_v2  ;;  %926 = vmatmul.mubr.f32.vlgmr.msra.gmra.mrb[4].mxu1 %v1260_v63 }
 0x489   :  { %1717 = vmatpush1.bf16.msra.mxu1 %v2113_v57 }
 0x48a   :  { %1719 = vmatprep.subr.bf16.mxu1 %v2115_v62 }
 0x48d   :  { %1721 = vmatpush1.bf16.msra.mxu1 %v2120_v6 }
 0x48e   :  { %1723 = vmatprep.subr.bf16.mxu1 %v2124_v9  ;;  %v1262_v9 = vld [vmem:[%s2359_s0 + $0x30] sm:$0xff] }
 0x491   :  { %1725 = vmatpush1.bf16.msra.mxu1 %v2128_v16 }
 0x492   :  { %1727 = vmatprep.subr.bf16.mxu1 %v2132_v17  ;;  %v189_v17 = vpop.xlane.xlu0 %188 }
 0x495   :  { %1729 = vmatpush1.bf16.msra.mxu1 %v2136_v24  ;;  %v190_v24 = vsub.f32 %v2061_v1, %v189_v17 }
 0x496   :  { %1731 = vmatprep.subr.bf16.mxu1 %v2140_v27  ;;  %v337_v27 = vpop.xlane.xlu0 %336 }
 0x497   :  { %v338_v41 = vsub.f32 %v2100_v19, %v337_v27 }
 0x499   :  { %1733 = vmatpush1.bf16.msra.mxu1 %v2144_v34  ;;  %v486_v34 = vpop.xlane.xlu1 %485 }
 0x49a   :  { %1735 = vmatprep.subr.bf16.mxu1 %v2148_v35  ;;  %v191_v35 = vmul.f32 1.442695, %v190_v24 }
 0x49c   :  { %1781 = vpow2.f32 %v191_v35 }
 0x49d   :  { %1737 = vmatpush1.bf16.msra.mxu1 %v2152_v42  ;;  %v487_v42 = vsub.f32 %v2108_v32, %v486_v34 }
 0x49e   :  { %1739 = vmatprep.subr.bf16.mxu1 %v2156_v43 }
 0x4a1   :  { %1741 = vmatpush1.bf16.msra.mxu1 %v2160_v49  ;;  %v488_v49 = vmul.f32 1.442695, %v487_v42 }
 0x4a2   :  { %1743 = vmatprep.subr.bf16.mxu1 %v2164_v52 }
 0x4a3   :  { %1783 = vpow2.f32 %v488_v49 }
 0x4a5   :  { %1745 = vmatpush1.bf16.msra.mxu1 %v2168_v61 }
 0x4a6   :  { %1747 = vmatprep.subr.bf16.mxu1 %v2172_v0  ;;  %v1782_v32 = vpop.eup %1781 }
 0x4a9   :  { %1749 = vmatpush1.bf16.msra.mxu1 %v2176_v20 }
 0x4aa   :  { %1751 = vmatprep.subr.bf16.mxu1 %v2180_v25 }
 0x4ad   :  { %1753 = vmatpush1.bf16.msra.mxu1 %v2184_v44  ;;  %v1264_v44 = vld [vmem:[%s2359_s0 + $0x38] sm:$0xff] }
 0x4ae   :  { %1755 = vmatprep.subr.bf16.mxu1 %v2188_v50  ;;  %v1784_v50 = vpop.eup %1783 }
 0x4b1   :  { %1757 = vmatpush1.bf16.msra.mxu1 %v2192_v4 }
 0x4b2   :  { %1759 = vmatprep.subr.bf16.mxu1 %v2196_v5 }
 0x4b5   :  { %1761 = vmatpush1.bf16.msra.mxu1 %v2200_v18 }
 0x4b6   :  { %1763 = vmatprep.subr.bf16.mxu1 %v2204_v21 }
 0x4b9   :  { %1765 = vmatpush1.bf16.msra.mxu1 %v2208_v30 }
 0x4ba   :  { %1767 = vmatprep.subr.bf16.mxu1 %v2212_v33 }
 0x4bd   :  { %1769 = vmatpush1.bf16.msra.mxu1 %v2216_v46  ;;  %v635_v46 = vpop.xlane.xlu1 %634 }
 0x4be   :  { %1771 = vmatprep.subr.bf16.mxu1 %v2220_v47  ;;  %v339_v47 = vmul.f32 1.442695, %v338_v41  ;;  %v636_v48 = vsub.f32 %v2246_v38, %v635_v46 }
 0x4c1   :  { %1773 = vmatpush1.bf16.msra.mxu1 %v2224_v53  ;;  %v637_v53 = vmul.f32 1.442695, %v636_v48 }
 0x4c2   :  { %1775 = vmatprep.subr.bf16.mxu1 %v2231_v60 }
 0x4c5   :  { %1777 = vmatpush1.bf16.msra.mxu1 %v2233_v13 }
 0x515   :  { %v784_v43 = vpop.xlane.xlu0 %783 }
 0x516   :  { %v785_v52 = vsub.f32 %v781_v2, %v784_v43 }
 0x518   :  { %v786_v0 = vmul.f32 1.442695, %v785_v52 }
 0x51a   :  { %1785 = vpow2.f32 %v786_v0 }
 0x524   :  { %v1786_v4 = vpop.eup %1785 }
 0x55b   :  { %v927_v57 = vpop.f32.mrb[4].mxu1 }
 0x55c   :  { %v928_v62 = vadd.f32 %v927_v57, %v2052_v55  ;;  %v929_v6 = vpop.f32.mrb[5].mxu1 }
 0x55d   :  { %v930_v16 = vadd.f32 %v929_v6, %v2054_v58 }
 0x55e   :  { %1074 = vmatprep.mubr.f32.mxu0 %v928_v62 }
 0x55f   :  { %932 = vmax.xlane.f32.xlu1 %v930_v16  ;;  %1075 = vmatmul.mubr.f32.vlgmr.msra.gmra.mrb[6].mxu0 %v1262_v9 }
 0x5ec   :  { %v933_v3 = vpop.xlane.xlu1 %932 }
 0x5ed   :  { %v934_v54 = vsub.f32 %v930_v16, %v933_v3 }
 0x5ef   :  { %v935_v60 = vmul.f32 1.442695, %v934_v54 }
 0x632   :  { %v1076_v61 = vpop.f32.mrb[6].mxu0 }
 0x633   :  { %v1077_v20 = vadd.f32 %v1076_v61, %v2052_v55  ;;  %v1078_v25 = vpop.f32.mrb[7].mxu0 }
 0x634   :  { %v1079_v1 = vadd.f32 %v1078_v25, %v2054_v58 }
 0x635   :  { %1223 = vmatprep.mubr.f32.mxu1 %v1077_v20 }
 0x636   :  { %1081 = vmax.xlane.f32.xlu0 %v1079_v1  ;;  %1224 = vmatmul.mubr.f32.vlgmr.msra.gmra.mrb[6].mxu1 %v1264_v44 }
 0x63a   :  { %193 = vadd.xlane.f32.xlu0 %v1782_v32 }
 0x63e   :  { %490 = vadd.xlane.f32.xlu0 %v1784_v50 }
 0x642   :  { %788 = vadd.xlane.f32.xlu0 %v1786_v4 }
 0x6c3   :  { %v1082_v5 = vpop.xlane.xlu0 %1081 }
 0x6c4   :  { %v1083_v10 = vsub.f32 %v1079_v1, %v1082_v5 }
 0x6c6   :  { %v1084_v11 = vmul.f32 1.442695, %v1083_v10 }
 0x6c7   :  { %v194_v12 = vpop.xlane.xlu0 %193 }
 0x6c8   :  { %1787 = vpow2.f32 %v1084_v11 }
 0x6c9   :  { %1789 = vlog2.f32 %v194_v12 }
 0x6cb   :  { %v491_v15 = vpop.xlane.xlu0 %490 }
 0x6cc   :  { %1791 = vlog2.f32 %v491_v15 }
 0x6cf   :  { %v789_v18 = vpop.xlane.xlu0 %788 }
 0x6d0   :  { %1793 = vlog2.f32 %v789_v18 }
 0x6d1   :  { %1795 = vpow2.f32 %v339_v47 }
 0x6d2   :  { %v1788_v21 = vpop.eup %1787  ;;  %1797 = vpow2.f32 %v637_v53 }
 0x6d3   :  { %v1790_v22 = vpop.eup %1789  ;;  %1086 = vadd.xlane.f32.xlu0 %v1788_v21  ;;  %1799 = vpow2.f32 %v935_v60 }
 0x6d4   :  { %v196_v23 = vmul.f32 0.6931472, %v1790_v22 }
 0x6d6   :  { %v1792_v28 = vpop.eup %1791  ;;  %v197_v29 = vsub.f32 %v190_v24, %v196_v23 }
 0x6d7   :  { %v493_v30 = vmul.f32 0.6931472, %v1792_v28 }
 0x6d8   :  { %198 = vst [vmem:[%s2363_s4] sm:$0xff] %v197_v29 }
 0x6d9   :  { %v494_v33 = vsub.f32 %v487_v42, %v493_v30 }
 0x6da   :  { %v1794_v36 = vpop.eup %1793 }
 0x6db   :  { %1255 = vst [vmem:[%s2363_s4 + $0x10] sm:$0xff] %v494_v33  ;;  %v791_v39 = vmul.f32 0.6931472, %v1794_v36  ;;  %v1796_v19 = vpop.eup %1795 }
 0x6dc   :  { %v1798_v14 = vpop.eup %1797 }
 0x6dd   :  { %v792_v40 = vsub.f32 %v785_v52, %v791_v39  ;;  %v1800_v26 = vpop.eup %1799 }
 0x6df   :  { %1259 = vst [vmem:[%s2363_s4 + $0x20] sm:$0xff] %v792_v40 }
 0x709   :  { %v1225_v59 = vpop.f32.mrb[6].mxu1 }
 0x70a   :  { %v1226_v7 = vadd.f32 %v1225_v59, %v2052_v55  ;;  %v1227_v8 = vpop.f32.mrb[7].mxu1 }
 0x70b   :  { %v1228_v13 = vadd.f32 %v1227_v8, %v2054_v58 }
 0x70c   :  { %1242 = vst [vmem:[%s2364_s5] sm:$0xff] %v1226_v7 }
 0x70d   :  { %1230 = vmax.xlane.f32.xlu1 %v1228_v13 }
 0x711   :  { %341 = vadd.xlane.f32.xlu1 %v1796_v19 }
 0x715   :  { %639 = vadd.xlane.f32.xlu1 %v1798_v14 }
 0x719   :  { %937 = vadd.xlane.f32.xlu1 %v1800_v26 }
 0x760   :  { %v1087_v31 = vpop.xlane.xlu0 %1086 }
 0x761   :  { %1801 = vlog2.f32 %v1087_v31 }
 0x76b   :  { %v1802_v37 = vpop.eup %1801 }
 0x76c   :  { %v1089_v38 = vmul.f32 0.6931472, %v1802_v37 }
 0x76e   :  { %v1090_v55 = vsub.f32 %v1083_v10, %v1089_v38 }
 0x770   :  { %1263 = vst [vmem:[%s2363_s4 + $0x30] sm:$0xff] %v1090_v55 }
 0x79a   :  { %v1231_v58 = vpop.xlane.xlu1 %1230 }
 0x79b   :  { %v1232_v45 = vsub.f32 %v1228_v13, %v1231_v58 }
 0x79d   :  { %v1233_v51 = vmul.f32 1.442695, %v1232_v45 }
 0x79e   :  { %v342_v56 = vpop.xlane.xlu1 %341 }
 0x79f   :  { %1803 = vpow2.f32 %v1233_v51 }
 0x7a0   :  { %1805 = vlog2.f32 %v342_v56 }
 0x7a2   :  { %v640_v63 = vpop.xlane.xlu1 %639 }
 0x7a3   :  { %1807 = vlog2.f32 %v640_v63 }
 0x7a6   :  { %v938_v2 = vpop.xlane.xlu1 %937 }
 0x7a7   :  { %1809 = vlog2.f32 %v938_v2 }
 0x7a9   :  { %v1804_v57 = vpop.eup %1803 }
 0x7aa   :  { %v1806_v62 = vpop.eup %1805  ;;  %1235 = vadd.xlane.f32.xlu1 %v1804_v57 }
 0x7ab   :  { %v344_v6 = vmul.f32 0.6931472, %v1806_v62 }
 0x7ad   :  { %v1808_v9 = vpop.eup %1807  ;;  %v345_v16 = vsub.f32 %v338_v41, %v344_v6 }
 0x7ae   :  { %v642_v17 = vmul.f32 0.6931472, %v1808_v9 }
 0x7af   :  { %1253 = vst [vmem:[%s2363_s4 + $0x8] sm:$0xff] %v345_v16 }
 0x7b0   :  { %v643_v24 = vsub.f32 %v636_v48, %v642_v17 }
 0x7b1   :  { %v1810_v27 = vpop.eup %1809 }
 0x7b2   :  { %1257 = vst [vmem:[%s2363_s4 + $0x18] sm:$0xff] %v643_v24  ;;  %v940_v34 = vmul.f32 0.6931472, %v1810_v27 }
 0x7b4   :  { %v941_v35 = vsub.f32 %v934_v54, %v940_v34 }
 0x7b6   :  { %1261 = vst [vmem:[%s2363_s4 + $0x28] sm:$0xff] %v941_v35 }
 0x837   :  { %v1236_v42 = vpop.xlane.xlu1 %1235 }
 0x838   :  { %1811 = vlog2.f32 %v1236_v42 }
 0x842   :  { %v1812_v43 = vpop.eup %1811 }
 0x843   :  { %v1238_v49 = vmul.f32 0.6931472, %v1812_v43 }
 0x845   :  { %v1239_v52 = vsub.f32 %v1232_v45, %v1238_v49 }
 0x847   :  { %1265 = vst [vmem:[%s2363_s4 + $0x38] sm:$0xff] %v1239_v52 }
 0x848   :  { %1251 = vsyncpa [#allocation3], 1 }

</bundles_post_ra>
